<compile_context>
chip_gen: v6e
topology: v6e:2x2x1
jax: 0.10.0
libtpu: 0.0.40
codegen_flags: <defaults>
</compile_context>

<pallas_src>
import functools

import numpy as np
import jax
import jax.numpy as jnp
from jax import lax
from jax.experimental import pallas as pl
from jax.experimental.pallas import tpu as pltpu

EPS = 1e-5                      # PyTorch nn.LayerNorm default
_GELU_C = 0.7978845608028654    # sqrt(2 / pi), tanh-GELU constant


def _swin_block_kernel(x_ref, g1_ref, b1_ref, w1_ref, bh_ref, w2_ref, bo_ref,
                       o_ref, *, eps, gelu_dtype):
  """One tile of tokens: out = x1 + MLP(LN2(x1)),  x1 = x + LN1(x).

  LayerNorm statistics are f32 two-pass; matmuls run on the MXU in the
  weights' dtype (bf16 by default) with f32 accumulation; the LN2 affine is
  already folded into (w1_ref, bh_ref) by the wrapper.
  """
  x = x_ref[...].astype(jnp.float32)                       # (tn, C)

  # ---- LayerNorm 1 + residual (affine kept: it feeds the residual) --------
  g1 = g1_ref[...]                                         # (1, C) f32
  b1 = b1_ref[...]
  mu1 = jnp.mean(x, axis=-1, keepdims=True)
  d1 = x - mu1
  var1 = jnp.mean(d1 * d1, axis=-1, keepdims=True)         # two-pass, >= 0
  x1 = x + d1 * lax.rsqrt(var1 + eps) * g1 + b1            # (tn, C) f32

  # ---- LayerNorm 2 (affine folded into W1'/b1' at prep time) --------------
  mu2 = jnp.mean(x1, axis=-1, keepdims=True)
  d2 = x1 - mu2
  var2 = jnp.mean(d2 * d2, axis=-1, keepdims=True)
  n2 = d2 * lax.rsqrt(var2 + eps)                          # (tn, C)

  # ---- MLP: Linear -> tanh-GELU -> Linear (MXU, f32 accumulation) ---------
  h = jnp.dot(n2.astype(w1_ref.dtype), w1_ref[...],
              preferred_element_type=jnp.float32)          # (tn, Hd) f32
  h = (h + bh_ref[...]).astype(gelu_dtype)                 # bf16 on v6e/v7x
  # tanh-GELU, refactored as h*(1 + c*h*h) to drop one multiply; tanh -> EUP.
  inner = h * (1.0 + 0.044715 * (h * h))
  h = 0.5 * h * (1.0 + jnp.tanh(_GELU_C * inner))
  y = jnp.dot(h.astype(w2_ref.dtype), w2_ref[...],
              preferred_element_type=jnp.float32)          # (tn, C) f32
  y = y + bo_ref[...]

  o_ref[...] = (x1 + y).astype(o_ref.dtype)


def prepare_swin_block_params(norm1_w, norm1_b, norm2_w, norm2_b,
                              mlp_w1, mlp_b1, mlp_w2, mlp_b2,
                              *, mxu_dtype=jnp.bfloat16):
  """One-time parameter prep — call at parameter-load time, NOT per forward.

  - transposes the torch nn.Linear weights to lane-dense (K, N) layout,
  - folds the LN2 affine into the first Linear
        h = (d2*rsqrt(var2+eps)) @ (gamma2[:,None] * W1ᵀ) + (b1 + beta2 @ W1ᵀ)
  - casts the matmul weights to the MXU feed dtype (bf16 by default,
    accumulation stays f32 inside the kernel).
  """
  f32 = jnp.float32
  C = norm1_w.shape[0]
  Hd = mlp_w1.shape[0]
  assert mlp_w1.shape == (Hd, C) and mlp_w2.shape == (C, Hd)

  w1t = mlp_w1.astype(f32).T                      # (C, Hd)
  w2t = mlp_w2.astype(f32).T                      # (Hd, C)
  w1f = norm2_w.astype(f32)[:, None] * w1t        # LN2 gamma folded
  b1f = norm2_b.astype(f32) @ w1t + mlp_b1.astype(f32)   # LN2 beta folded

  row = lambda p: p.astype(f32).reshape(1, -1)
  return dict(
      g1=row(norm1_w), b1=row(norm1_b),
      w1=w1f.astype(mxu_dtype), bh=b1f.reshape(1, -1),
      w2=w2t.astype(mxu_dtype), bo=row(mlp_b2),
  )


def _round_up(v, m):
  return (v + m - 1) // m * m


def _elementwise_dtype():
  """bf16 elementwise on v6e/v7x (bf16 VPU/EUP); f32 on v5e and older."""
  try:
    kind = jax.devices()[0].device_kind.lower()
  except Exception:
    return jnp.float32
  return jnp.bfloat16 if ("v6" in kind or "v7" in kind) else jnp.float32


def _vmem_budget(tile_n, C, Hd, x_bytes, w_bytes, gelu_bytes):
  io = 2 * 2 * tile_n * C * x_bytes            # double-buffered in + out tiles
  weights = 2 * C * Hd * w_bytes               # W1', W2ᵀ (single-buffered)
  params = (3 * C + Hd) * 4                    # g1, b1, bo, bh (f32 rows)
  interm = 6 * tile_n * C * 4                  # x/x1/n2/y + f32 temporaries
  hid = tile_n * Hd * (4 + 2 * gelu_bytes)     # f32 matmul acc + GELU temps
  return io + weights + params + interm + hid + (2 << 20)


_HAS_BUFFERED = hasattr(pl, "Buffered")


def _const_spec(shape):
  """BlockSpec for a grid-invariant operand: single-buffered, VMEM resident."""
  if _HAS_BUFFERED:
    try:
      return pl.BlockSpec(shape, lambda i: (0, 0), pipeline_mode=pl.Buffered(1))
    except TypeError:
      pass
  return pl.BlockSpec(shape, lambda i: (0, 0))


def swin_transformer_block(x, params, *, tile_n=1024, gelu_dtype=None):
  """SwinTransformerBlock forward (live datapath).

  x:      (B, H, W, C)
  params: dict from prepare_swin_block_params()
  Returns (B, H, W, C).
  """
  B, H, W, C = x.shape
  Hd = params["w1"].shape[1]
  assert params["w1"].shape == (C, Hd) and params["w2"].shape == (Hd, C)

  N = B * H * W
  x_bytes = jnp.dtype(x.dtype).itemsize
  w_bytes = jnp.dtype(params["w1"].dtype).itemsize
  if gelu_dtype is None:
    gelu_dtype = _elementwise_dtype()
  gelu_bytes = jnp.dtype(gelu_dtype).itemsize

  # ---- choose the token tile ------------------------------------------------
  tile_n = max(8, min(_round_up(tile_n, 8), _round_up(N, 8)))
  if N >= 16:
    # keep at least 2 grid steps so both v7x TensorCores get work
    tile_n = min(tile_n, _round_up(pl.cdiv(N, 2), 8))
  # shrink the tile (not just the limit) so we fit the 64 MiB v7x VMEM ceiling
  while (_vmem_budget(tile_n, C, Hd, x_bytes, w_bytes, gelu_bytes) > (60 << 20)
         and tile_n > 64):
    tile_n //= 2
  tile_n = max(8, _round_up(tile_n, 8))
  # prefer a divisor of N to avoid the pad + slice HBM round trips
  if N % 8 == 0 and N % tile_n != 0:
    for t in range(tile_n, max(8, tile_n // 2) - 1, -8):
      if N % t == 0:
        tile_n = t
        break
  # TODO(synk): for very large C/Hd where resident weights alone exceed the
  # v7x VMEM ceiling, add an Hd grid axis ("arbitrary") with an accumulator
  # scratch instead of full weight residency.

  n_tiles = pl.cdiv(N, tile_n)
  n_pad = n_tiles * tile_n

  x_flat = x.reshape(N, C)
  if n_pad != N:
    # Zero-padded tail rows: LayerNorm of a constant row stays finite
    # (var=0 -> rsqrt(eps)); padded rows are sliced off afterwards.
    x_flat = jnp.pad(x_flat, ((0, n_pad - N), (0, 0)))

  budget = _vmem_budget(tile_n, C, Hd, x_bytes, w_bytes, gelu_bytes)
  vmem_limit = int(min(max(budget, 32 << 20), 64 << 20))   # valid on v5e/v6e/v7x

  cost = pl.CostEstimate(
      flops=4 * n_pad * C * Hd,                 # two matmuls: 2*M*K*N each
      transcendentals=n_pad * Hd,               # tanh in the GELU
      bytes_accessed=(2 * n_pad * C * x_bytes   # token tile in + out
                      + 2 * C * Hd * w_bytes))  # resident MLP weights

  kernel = functools.partial(_swin_block_kernel, eps=EPS, gelu_dtype=gelu_dtype)

  # NOTE: with C < 128 the (tile_n, C) blocks are not lane-dense; this shape is
  # HBM/VPU bound, so tiles are sized for bandwidth, not MXU utilisation.
  out_flat = pl.pallas_call(
      kernel,
      out_shape=jax.ShapeDtypeStruct((n_pad, C), x.dtype),
      grid_spec=pltpu.PrefetchScalarGridSpec(
          num_scalar_prefetch=0,
          grid=(n_tiles,),
          in_specs=[
              pl.BlockSpec((tile_n, C), lambda i: (i, 0)),   # x tokens
              _const_spec((1, C)),                           # norm1 gamma
              _const_spec((1, C)),                           # norm1 beta
              _const_spec((C, Hd)),                          # W1' (LN2-folded)
              _const_spec((1, Hd)),                          # b1'
              _const_spec((Hd, C)),                          # W2ᵀ
              _const_spec((1, C)),                           # b2
          ],
          out_specs=pl.BlockSpec((tile_n, C), lambda i: (i, 0)),
      ),
      compiler_params=pltpu.CompilerParams(
          dimension_semantics=("parallel",),
          vmem_limit_bytes=vmem_limit),
      cost_estimate=cost,
  )(x_flat, params["g1"], params["b1"], params["w1"], params["bh"],
    params["w2"], params["bo"])

  out_flat = out_flat if n_pad == N else out_flat[:N]
  return out_flat.reshape(B, H, W, C)


def _reference(x, g1, b1, g2, b2, w1, bh, w2, bo):
  """Pure-JAX f32 mirror of the PyTorch SwinTransformerBlock.forward output."""
  def ln(v, g, b):
    mu = v.mean(axis=-1, keepdims=True)
    var = ((v - mu) ** 2).mean(axis=-1, keepdims=True)
    return (v - mu) / jnp.sqrt(var + EPS) * g + b

  x1 = x + ln(x, g1, b1)                                  # skip + norm1(x)
  n2 = ln(x1, g2, b2)
  h = jnp.einsum('bhwc,oc->bhwo', n2, w1,
                 precision=lax.Precision.HIGHEST) + bh
  h = 0.5 * h * (1.0 + jnp.tanh(_GELU_C * (h + 0.044715 * h ** 3)))
  y = jnp.einsum('bhwo,co->bhwc', h, w2,
                 precision=lax.Precision.HIGHEST) + bo
  return x1 + y


if __name__ == "__main__":
  # Small deterministic example consistent with the module:
  # SwinTransformerBlock(in_dim=32, n_heads=1, img_shape=(16, 16),
  #                      wdw_size=4, shift=0, mlp_factor=4.0)
  B, H, W, C = 2, 16, 16, 32
  Hd = int(C * 4.0)

  key = jax.random.PRNGKey(0)
  ks = jax.random.split(key, 9)
  x = jax.random.normal(ks[0], (B, H, W, C), dtype=jnp.float32)
  norm1_w = 1.0 + 0.05 * jax.random.normal(ks[1], (C,), dtype=jnp.float32)
  norm1_b = 0.02 * jax.random.normal(ks[2], (C,), dtype=jnp.float32)
  norm2_w = 1.0 + 0.05 * jax.random.normal(ks[3], (C,), dtype=jnp.float32)
  norm2_b = 0.02 * jax.random.normal(ks[4], (C,), dtype=jnp.float32)
  mlp_w1 = 0.05 * jax.random.normal(ks[5], (Hd, C), dtype=jnp.float32)
  mlp_b1 = 0.02 * jax.random.normal(ks[6], (Hd,), dtype=jnp.float32)
  mlp_w2 = 0.05 * jax.random.normal(ks[7], (C, Hd), dtype=jnp.float32)
  mlp_b2 = 0.02 * jax.random.normal(ks[8], (C,), dtype=jnp.float32)

  # One-time parameter prep (transpose + LN2 fold + bf16 cast) at "load time".
  params = prepare_swin_block_params(norm1_w, norm1_b, norm2_w, norm2_b,
                                     mlp_w1, mlp_b1, mlp_w2, mlp_b2)

  out = swin_transformer_block(x, params)
  out = jax.block_until_ready(out)

  ref = jax.block_until_ready(_reference(x, norm1_w, norm1_b, norm2_w, norm2_b,
                                         mlp_w1, mlp_b1, mlp_w2, mlp_b2))

  assert out.shape == (B, H, W, C), out.shape
  # Tolerance loosened vs. the f32 reference because the MXU is fed in bf16
  # (f32 accumulation) and the GELU runs in bf16 on v6e/v7x.
  np.testing.assert_allclose(np.asarray(out), np.asarray(ref),
                             rtol=1e-2, atol=1e-2)
  print("KERNEL_OK")
</pallas_src>

<mosaic_0001>
module attributes {stable_mosaic.version = 11 : i64} {
  func.func @_swin_block_kernel(%arg0: i32, %arg1: memref<256x32xf32, #tpu.memory_space<vmem>>, %arg2: memref<1x32xf32, #tpu.memory_space<vmem>>, %arg3: memref<1x32xf32, #tpu.memory_space<vmem>>, %arg4: memref<32x128xbf16, #tpu.memory_space<vmem>>, %arg5: memref<1x128xf32, #tpu.memory_space<vmem>>, %arg6: memref<128x32xbf16, #tpu.memory_space<vmem>>, %arg7: memref<1x32xf32, #tpu.memory_space<vmem>>, %arg8: memref<256x32xf32, #tpu.memory_space<vmem>>) attributes {dimension_semantics = [#tpu.dimension_semantics<parallel>], iteration_bounds = array<i64: 2>, scalar_prefetch = 0 : i64, scratch_operands = 0 : i64, tpu.core_type = #tpu.core_type<tc>, window_params = [{transform_indices = @transform_0, window_bounds = array<i64: 256, 32>}, {pipeline_mode = #tpu.pipeline_mode<synchronous>, transform_indices = @transform_1, window_bounds = array<i64: 1, 32>}, {pipeline_mode = #tpu.pipeline_mode<synchronous>, transform_indices = @transform_2, window_bounds = array<i64: 1, 32>}, {pipeline_mode = #tpu.pipeline_mode<synchronous>, transform_indices = @transform_3, window_bounds = array<i64: 32, 128>}, {pipeline_mode = #tpu.pipeline_mode<synchronous>, transform_indices = @transform_4, window_bounds = array<i64: 1, 128>}, {pipeline_mode = #tpu.pipeline_mode<synchronous>, transform_indices = @transform_5, window_bounds = array<i64: 128, 32>}, {pipeline_mode = #tpu.pipeline_mode<synchronous>, transform_indices = @transform_6, window_bounds = array<i64: 1, 32>}, {transform_indices = @transform_7, window_bounds = array<i64: 256, 32>}]} {
    %c0 = arith.constant 0 : index
    %c0_0 = arith.constant 0 : index
    %0 = vector.load %arg1[%c0, %c0_0] : memref<256x32xf32, #tpu.memory_space<vmem>>, vector<256x32xf32>
    %c0_1 = arith.constant 0 : index
    %c0_2 = arith.constant 0 : index
    %1 = vector.load %arg2[%c0_1, %c0_2] : memref<1x32xf32, #tpu.memory_space<vmem>>, vector<1x32xf32>
    %c0_3 = arith.constant 0 : index
    %c0_4 = arith.constant 0 : index
    %2 = vector.load %arg3[%c0_3, %c0_4] : memref<1x32xf32, #tpu.memory_space<vmem>>, vector<1x32xf32>
    %cst = arith.constant dense<0.000000e+00> : vector<256xf32>
    %3 = vector.multi_reduction <add>, %0, %cst [1] : vector<256x32xf32> to vector<256xf32>
    %4 = vector.shape_cast %3 : vector<256xf32> to vector<256x1xf32>
    %cst_5 = arith.constant 3.200000e+01 : f32
    %5 = vector.broadcast %cst_5 : f32 to vector<256x1xf32>
    %6 = arith.divf %4, %5 : vector<256x1xf32>
    %7 = vector.broadcast %6 : vector<256x1xf32> to vector<256x32xf32>
    %8 = arith.subf %0, %7 : vector<256x32xf32>
    %9 = arith.mulf %8, %8 : vector<256x32xf32>
    %cst_6 = arith.constant dense<0.000000e+00> : vector<256xf32>
    %10 = vector.multi_reduction <add>, %9, %cst_6 [1] : vector<256x32xf32> to vector<256xf32>
    %11 = vector.shape_cast %10 : vector<256xf32> to vector<256x1xf32>
    %cst_7 = arith.constant 3.200000e+01 : f32
    %12 = vector.broadcast %cst_7 : f32 to vector<256x1xf32>
    %13 = arith.divf %11, %12 : vector<256x1xf32>
    %cst_8 = arith.constant 9.99999974E-6 : f32
    %14 = vector.broadcast %cst_8 : f32 to vector<256x1xf32>
    %15 = arith.addf %13, %14 : vector<256x1xf32>
    %16 = math.rsqrt %15 : vector<256x1xf32>
    %17 = vector.broadcast %16 : vector<256x1xf32> to vector<256x32xf32>
    %18 = arith.mulf %8, %17 : vector<256x32xf32>
    %19 = vector.broadcast %1 : vector<1x32xf32> to vector<256x32xf32>
    %20 = arith.mulf %18, %19 : vector<256x32xf32>
    %21 = arith.addf %0, %20 : vector<256x32xf32>
    %22 = vector.broadcast %2 : vector<1x32xf32> to vector<256x32xf32>
    %23 = arith.addf %21, %22 : vector<256x32xf32>
    %cst_9 = arith.constant dense<0.000000e+00> : vector<256xf32>
    %24 = vector.multi_reduction <add>, %23, %cst_9 [1] : vector<256x32xf32> to vector<256xf32>
    %25 = vector.shape_cast %24 : vector<256xf32> to vector<256x1xf32>
    %cst_10 = arith.constant 3.200000e+01 : f32
    %26 = vector.broadcast %cst_10 : f32 to vector<256x1xf32>
    %27 = arith.divf %25, %26 : vector<256x1xf32>
    %28 = vector.broadcast %27 : vector<256x1xf32> to vector<256x32xf32>
    %29 = arith.subf %23, %28 : vector<256x32xf32>
    %30 = arith.mulf %29, %29 : vector<256x32xf32>
    %cst_11 = arith.constant dense<0.000000e+00> : vector<256xf32>
    %31 = vector.multi_reduction <add>, %30, %cst_11 [1] : vector<256x32xf32> to vector<256xf32>
    %32 = vector.shape_cast %31 : vector<256xf32> to vector<256x1xf32>
    %cst_12 = arith.constant 3.200000e+01 : f32
    %33 = vector.broadcast %cst_12 : f32 to vector<256x1xf32>
    %34 = arith.divf %32, %33 : vector<256x1xf32>
    %cst_13 = arith.constant 9.99999974E-6 : f32
    %35 = vector.broadcast %cst_13 : f32 to vector<256x1xf32>
    %36 = arith.addf %34, %35 : vector<256x1xf32>
    %37 = math.rsqrt %36 : vector<256x1xf32>
    %38 = vector.broadcast %37 : vector<256x1xf32> to vector<256x32xf32>
    %39 = arith.mulf %29, %38 : vector<256x32xf32>
    %40 = arith.truncf %39 : vector<256x32xf32> to vector<256x32xbf16>
    %c0_14 = arith.constant 0 : index
    %c0_15 = arith.constant 0 : index
    %41 = vector.load %arg4[%c0_14, %c0_15] : memref<32x128xbf16, #tpu.memory_space<vmem>>, vector<32x128xbf16>
    %cst_16 = arith.constant dense<0.000000e+00> : vector<256x128xf32>
    %42 = tpu.matmul %40, %41, %cst_16 {dimension_numbers = #tpu.dot_dimension_numbers<[1], [0], [0], [1], [0, 0, 1, 1], [], []>} : vector<256x32xbf16>, vector<32x128xbf16>, vector<256x128xf32> -> vector<256x128xf32>
    %c0_17 = arith.constant 0 : index
    %c0_18 = arith.constant 0 : index
    %43 = vector.load %arg5[%c0_17, %c0_18] : memref<1x128xf32, #tpu.memory_space<vmem>>, vector<1x128xf32>
    %44 = vector.broadcast %43 : vector<1x128xf32> to vector<256x128xf32>
    %45 = arith.addf %42, %44 : vector<256x128xf32>
    %46 = arith.mulf %45, %45 : vector<256x128xf32>
    %cst_19 = arith.constant 4.471500e-02 : f32
    %47 = vector.broadcast %cst_19 : f32 to vector<256x128xf32>
    %48 = arith.mulf %47, %46 : vector<256x128xf32>
    %cst_20 = arith.constant 1.000000e+00 : f32
    %49 = vector.broadcast %cst_20 : f32 to vector<256x128xf32>
    %50 = arith.addf %49, %48 : vector<256x128xf32>
    %51 = arith.mulf %45, %50 : vector<256x128xf32>
    %cst_21 = arith.constant 5.000000e-01 : f32
    %52 = vector.broadcast %cst_21 : f32 to vector<256x128xf32>
    %53 = arith.mulf %52, %45 : vector<256x128xf32>
    %cst_22 = arith.constant 0.797884583 : f32
    %54 = vector.broadcast %cst_22 : f32 to vector<256x128xf32>
    %55 = arith.mulf %54, %51 : vector<256x128xf32>
    %56 = math.tanh %55 : vector<256x128xf32>
    %cst_23 = arith.constant 1.000000e+00 : f32
    %57 = vector.broadcast %cst_23 : f32 to vector<256x128xf32>
    %58 = arith.addf %57, %56 : vector<256x128xf32>
    %59 = arith.mulf %53, %58 : vector<256x128xf32>
    %60 = arith.truncf %59 : vector<256x128xf32> to vector<256x128xbf16>
    %c0_24 = arith.constant 0 : index
    %c0_25 = arith.constant 0 : index
    %61 = vector.load %arg6[%c0_24, %c0_25] : memref<128x32xbf16, #tpu.memory_space<vmem>>, vector<128x32xbf16>
    %cst_26 = arith.constant dense<0.000000e+00> : vector<256x32xf32>
    %62 = tpu.matmul %60, %61, %cst_26 {dimension_numbers = #tpu.dot_dimension_numbers<[1], [0], [0], [1], [0, 0, 1, 1], [], []>} : vector<256x128xbf16>, vector<128x32xbf16>, vector<256x32xf32> -> vector<256x32xf32>
    %c0_27 = arith.constant 0 : index
    %c0_28 = arith.constant 0 : index
    %63 = vector.load %arg7[%c0_27, %c0_28] : memref<1x32xf32, #tpu.memory_space<vmem>>, vector<1x32xf32>
    %64 = vector.broadcast %63 : vector<1x32xf32> to vector<256x32xf32>
    %65 = arith.addf %62, %64 : vector<256x32xf32>
    %66 = arith.addf %23, %65 : vector<256x32xf32>
    %c0_29 = arith.constant 0 : index
    %c0_30 = arith.constant 0 : index
    %67 = vector.load %arg8[%c0_29, %c0_30] : memref<256x32xf32, #tpu.memory_space<vmem>>, vector<256x32xf32>
    tpu.vector_store %arg8[%c0_29, %c0_30], %66 {strides = array<i32>} : memref<256x32xf32, #tpu.memory_space<vmem>>, vector<256x32xf32>,
    return
  }
  func.func @transform_0(%arg0: i32) -> (i32, i32) {
    %c0_i32 = arith.constant 0 : i32
    %c0_i32_0 = arith.constant 0 : i32
    return %arg0, %c0_i32 : i32, i32
  }
  func.func @transform_1(%arg0: i32) -> (i32, i32) {
    %c0_i32 = arith.constant 0 : i32
    %c0_i32_0 = arith.constant 0 : i32
    %c0_i32_1 = arith.constant 0 : i32
    return %c0_i32, %c0_i32_0 : i32, i32
  }
  func.func @transform_2(%arg0: i32) -> (i32, i32) {
    %c0_i32 = arith.constant 0 : i32
    %c0_i32_0 = arith.constant 0 : i32
    %c0_i32_1 = arith.constant 0 : i32
    return %c0_i32, %c0_i32_0 : i32, i32
  }
  func.func @transform_3(%arg0: i32) -> (i32, i32) {
    %c0_i32 = arith.constant 0 : i32
    %c0_i32_0 = arith.constant 0 : i32
    %c0_i32_1 = arith.constant 0 : i32
    return %c0_i32, %c0_i32_0 : i32, i32
  }
  func.func @transform_4(%arg0: i32) -> (i32, i32) {
    %c0_i32 = arith.constant 0 : i32
    %c0_i32_0 = arith.constant 0 : i32
    %c0_i32_1 = arith.constant 0 : i32
    return %c0_i32, %c0_i32_0 : i32, i32
  }
  func.func @transform_5(%arg0: i32) -> (i32, i32) {
    %c0_i32 = arith.constant 0 : i32
    %c0_i32_0 = arith.constant 0 : i32
    %c0_i32_1 = arith.constant 0 : i32
    return %c0_i32, %c0_i32_0 : i32, i32
  }
  func.func @transform_6(%arg0: i32) -> (i32, i32) {
    %c0_i32 = arith.constant 0 : i32
    %c0_i32_0 = arith.constant 0 : i32
    %c0_i32_1 = arith.constant 0 : i32
    return %c0_i32, %c0_i32_0 : i32, i32
  }
  func.func @transform_7(%arg0: i32) -> (i32, i32) {
    %c0_i32 = arith.constant 0 : i32
    %c0_i32_0 = arith.constant 0 : i32
    return %arg0, %c0_i32 : i32, i32
  }
}

</mosaic_0001>

<bundles_post_ra>
// kernel: tpu_custom_call.1
= control target key start
LH: loop header
LB: loop body
LE: loop exit
PB: predicated region body
PF: predicated region fallthrough
CT: control target
= control target key end

     0   :  { %s2613_s24 = smov 0   ;;  %s3876_s0 = inlined_call_operand.vmem [shape: f32[512,32], index: 0, kind: input, shape index: {}]   ;;  %s3877_s1 = inlined_call_operand.vmem [shape: f32[1,32], index: 1, kind: input, shape index: {}]   ;;  %s3878_s2 = inlined_call_operand.vmem [shape: f32[1,32], index: 2, kind: input, shape index: {}]   ;;  %s3879_s3 = inlined_call_operand.vmem [shape: bf16[32,128], index: 3, kind: input, shape index: {}]   ;;  %s3880_s4 = inlined_call_operand.vmem [shape: f32[1,128], index: 4, kind: input, shape index: {}]   ;;  %s3881_s5 = inlined_call_operand.vmem [shape: bf16[128,32], index: 5, kind: input, shape index: {}]   ;;  %s3882_s6 = inlined_call_operand.vmem [shape: f32[1,32], index: 6, kind: input, shape index: {}]   ;;  %s3883_s7 = inlined_call_operand.vmem [shape: f32[512,32], index: 7, kind: output, shape index: {}]  }
   0x1 LB: > { %s2163_s25 = sadd.s32 4294967295, %s2571_s24   ;;  %p2167_p0 = scmp.ge.s32.totalorder %s2571_s24, 1  ;;  %s2571_s24 = sphi %s2613_s24, %s17_s24  }
   0x2   : > { %p238_p1 = scmp.lt.s32.totalorder %s2571_s24, 3 }
   0x4   : > { %p239_p2 = pnand %p2167_p0, %p238_p1 }
   0x6   : > { %242 = sbr.rel (%p239_p2) target bundleno = 1148 (0x47c), region = 48 }
   0xb   : > { %s2168_s26 = sshll.u32 %s2163_s25, 5  ;;  %vm317_vm0 = vcmask 261120  }
   0xc   : > { %p271_p3 = scmp.lt.s32.totalorder %s2168_s26, 63 }
   0xe   : > { %s3978_s26 = smov (!%p271_p3, %s2168_s26), 63 }
   0xf   : > { %s2169_s27 = sshll.u32 %s3978_s26, 3 }
  0x10   : > { %s2629_s30 = scalar_lea.vmem %s3876_s0, %s2169_s27  ;;  %s3744_s18 = scalar_lea.vmem %s3883_s7, %s2169_s27 }
  0x11   : > { %v2632_v0 = vld [vmem:[%s2629_s30] sm:$0xff]  ;;  %v2635_v1 = vld [vmem:[%s2629_s30 + $0x10] sm:$0xff]  ;;  %v2638_v2 = vld [vmem:[%s2629_s30 + $0x8] sm:$0xff] }
  0x12   : > { %v318_v3 = vsel %vm317_vm0, %v2632_v0, 0.0  ;;  %v324_v4 = vsel %vm317_vm0, %v2635_v1, 0.0  ;;  %v2645_v5 = vld [vmem:[%s2629_s30 + $0x18] sm:$0xff]  ;;  %v321_v6 = vsel %vm317_vm0, %v2638_v2, 0.0  ;;  %v2652_v8 = vld [vmem:[%s2629_s30 + $0x20] sm:$0xff]  ;;  %v2655_v9 = vld [vmem:[%s2629_s30 + $0x28] sm:$0xff] }
  0x13   : > { %319 = vadd.xlane.f32.xlu0 %v318_v3  ;;  %325 = vadd.xlane.f32.xlu1 %v324_v4  ;;  %v327_v7 = vsel %vm317_vm0, %v2645_v5, 0.0  ;;  %v330_v10 = vsel %vm317_vm0, %v2652_v8, 0.0  ;;  %v333_v11 = vsel %vm317_vm0, %v2655_v9, 0.0  ;;  %v2662_v12 = vld [vmem:[%s2629_s30 + $0x30] sm:$0xff]  ;;  %v2665_v13 = vld [vmem:[%s2629_s30 + $0x38] sm:$0xff]  ;;  %v2672_v16 = vld [vmem:[%s2629_s30 + $0x40] sm:$0xff] }
  0x14   : > { %v336_v14 = vsel %vm317_vm0, %v2662_v12, 0.0  ;;  %v339_v15 = vsel %vm317_vm0, %v2665_v13, 0.0  ;;  %v2675_v17 = vld [vmem:[%s2629_s30 + $0x48] sm:$0xff]  ;;  %v342_v18 = vsel %vm317_vm0, %v2672_v16, 0.0  ;;  %v2682_v20 = vld [vmem:[%s2629_s30 + $0x50] sm:$0xff]  ;;  %v2685_v21 = vld [vmem:[%s2629_s30 + $0x58] sm:$0xff] }
  0x15   : > { %v345_v19 = vsel %vm317_vm0, %v2675_v17, 0.0  ;;  %v348_v22 = vsel %vm317_vm0, %v2682_v20, 0.0  ;;  %v351_v23 = vsel %vm317_vm0, %v2685_v21, 0.0  ;;  %v2692_v24 = vld [vmem:[%s2629_s30 + $0x60] sm:$0xff]  ;;  %v2695_v25 = vld [vmem:[%s2629_s30 + $0x68] sm:$0xff]  ;;  %v2702_v28 = vld [vmem:[%s2629_s30 + $0x70] sm:$0xff] }
  0x16   : > { %v354_v26 = vsel %vm317_vm0, %v2692_v24, 0.0  ;;  %v357_v27 = vsel %vm317_vm0, %v2695_v25, 0.0  ;;  %v2705_v29 = vld [vmem:[%s2629_s30 + $0x78] sm:$0xff]  ;;  %v360_v30 = vsel %vm317_vm0, %v2702_v28, 0.0  ;;  %v2712_v32 = vld [vmem:[%s2629_s30 + $0x80] sm:$0xff]  ;;  %v2715_v33 = vld [vmem:[%s2629_s30 + $0x88] sm:$0xff] }
  0x17   : > { %322 = vadd.xlane.f32.xlu0 %v321_v6  ;;  %328 = vadd.xlane.f32.xlu1 %v327_v7  ;;  %v363_v31 = vsel %vm317_vm0, %v2705_v29, 0.0  ;;  %v366_v34 = vsel %vm317_vm0, %v2712_v32, 0.0  ;;  %v369_v35 = vsel %vm317_vm0, %v2715_v33, 0.0  ;;  %v2722_v36 = vld [vmem:[%s2629_s30 + $0x90] sm:$0xff]  ;;  %v2725_v37 = vld [vmem:[%s2629_s30 + $0x98] sm:$0xff]  ;;  %v2732_v40 = vld [vmem:[%s2629_s30 + $0xa0] sm:$0xff] }
  0x18   : > { %3915 = vst [vmem:[#allocation2_spill] sm:$0xff] %v2722_v36  ;;  %3916 = vst [vmem:[#allocation3_spill] sm:$0xff] %v2725_v37  ;;  %v372_v38 = vsel %vm317_vm0, %v2722_v36, 0.0  ;;  %v375_v39 = vsel %vm317_vm0, %v2725_v37, 0.0  ;;  %v2735_v41 = vld [vmem:[%s2629_s30 + $0xa8] sm:$0xff]  ;;  %v378_v42 = vsel %vm317_vm0, %v2732_v40, 0.0 }
  0x19   : > { %3917 = vst [vmem:[#allocation4_spill] sm:$0xff] %v2732_v40  ;;  %3918 = vst [vmem:[#allocation5_spill] sm:$0xff] %v2735_v41  ;;  %v381_v43 = vsel %vm317_vm0, %v2735_v41, 0.0  ;;  %v2742_v44 = vld [vmem:[%s2629_s30 + $0xb0] sm:$0xff]  ;;  %v2745_v45 = vld [vmem:[%s2629_s30 + $0xb8] sm:$0xff] }
  0x1a   : > { %3919 = vst [vmem:[#allocation6_spill] sm:$0xff] %v2742_v44  ;;  %v384_v46 = vsel %vm317_vm0, %v2742_v44, 0.0  ;;  %v387_v47 = vsel %vm317_vm0, %v2745_v45, 0.0  ;;  %v2752_v48 = vld [vmem:[%s2629_s30 + $0xc0] sm:$0xff]  ;;  %v2755_v49 = vld [vmem:[%s2629_s30 + $0xc8] sm:$0xff]  ;;  %v2762_v52 = vld [vmem:[%s2629_s30 + $0xd0] sm:$0xff] }
  0x1b   : > { %331 = vadd.xlane.f32.xlu0 %v330_v10  ;;  %334 = vadd.xlane.f32.xlu1 %v333_v11  ;;  %v390_v50 = vsel %vm317_vm0, %v2752_v48, 0.0  ;;  %v393_v51 = vsel %vm317_vm0, %v2755_v49, 0.0  ;;  %v2765_v53 = vld [vmem:[%s2629_s30 + $0xd8] sm:$0xff]  ;;  %v396_v54 = vsel %vm317_vm0, %v2762_v52, 0.0  ;;  %v2772_v56 = vld [vmem:[%s2629_s30 + $0xe0] sm:$0xff]  ;;  %v2775_v57 = vld [vmem:[%s2629_s30 + $0xe8] sm:$0xff] }
  0x1c   : > { %v399_v55 = vsel %vm317_vm0, %v2765_v53, 0.0  ;;  %v402_v58 = vsel %vm317_vm0, %v2772_v56, 0.0  ;;  %v405_v59 = vsel %vm317_vm0, %v2775_v57, 0.0  ;;  %v2782_v60 = vld [vmem:[%s2629_s30 + $0xf0] sm:$0xff]  ;;  %v2785_v61 = vld [vmem:[%s2629_s30 + $0xf8] sm:$0xff] }
  0x1d   : > { %v408_v62 = vsel %vm317_vm0, %v2782_v60, 0.0  ;;  %v411_v63 = vsel %vm317_vm0, %v2785_v61, 0.0 }
  0x1f   : > { %337 = vadd.xlane.f32.xlu0 %v336_v14  ;;  %340 = vadd.xlane.f32.xlu1 %v339_v15 }
  0x23   : > { %343 = vadd.xlane.f32.xlu0 %v342_v18  ;;  %346 = vadd.xlane.f32.xlu1 %v345_v19 }
  0x27   : > { %349 = vadd.xlane.f32.xlu0 %v348_v22  ;;  %352 = vadd.xlane.f32.xlu1 %v351_v23 }
  0x2b   : > { %355 = vadd.xlane.f32.xlu0 %v354_v26  ;;  %358 = vadd.xlane.f32.xlu1 %v357_v27 }
  0x2f   : > { %361 = vadd.xlane.f32.xlu0 %v360_v30  ;;  %364 = vadd.xlane.f32.xlu1 %v363_v31 }
  0x33   : > { %367 = vadd.xlane.f32.xlu0 %v366_v34  ;;  %370 = vadd.xlane.f32.xlu1 %v369_v35 }
  0x37   : > { %373 = vadd.xlane.f32.xlu0 %v372_v38  ;;  %376 = vadd.xlane.f32.xlu1 %v375_v39 }
  0x3b   : > { %379 = vadd.xlane.f32.xlu0 %v378_v42  ;;  %382 = vadd.xlane.f32.xlu1 %v381_v43 }
  0x3f   : > { %385 = vadd.xlane.f32.xlu0 %v384_v46  ;;  %388 = vadd.xlane.f32.xlu1 %v387_v47 }
  0x43   : > { %391 = vadd.xlane.f32.xlu0 %v390_v50  ;;  %394 = vadd.xlane.f32.xlu1 %v393_v51 }
  0x47   : > { %397 = vadd.xlane.f32.xlu0 %v396_v54  ;;  %400 = vadd.xlane.f32.xlu1 %v399_v55 }
  0x4b   : > { %403 = vadd.xlane.f32.xlu0 %v402_v58  ;;  %406 = vadd.xlane.f32.xlu1 %v405_v59 }
  0x4f   : > { %409 = vadd.xlane.f32.xlu0 %v408_v62  ;;  %412 = vadd.xlane.f32.xlu1 %v411_v63 }
  0x9c   : > { %v320_v3 = vpop.xlane.xlu0 %319  ;;  %v326_v4 = vpop.xlane.xlu1 %325 }
  0x9d   : > { %v415_v6 = vmul.f32 0.03125, %v320_v3  ;;  %v417_v7 = vmul.f32 0.03125, %v326_v4 }
  0x9f   : > { %v2792_v10 = vsub.f32 %v2632_v0, %v415_v6  ;;  %v2795_v11 = vsub.f32 %v2635_v1, %v417_v7 }
  0xa0   : > { %v323_v14 = vpop.xlane.xlu0 %322  ;;  %v329_v15 = vpop.xlane.xlu1 %328 }
  0xa1   : > { %v416_v18 = vmul.f32 0.03125, %v323_v14  ;;  %v418_v19 = vmul.f32 0.03125, %v329_v15  ;;  %v479_v22 = vmul.f32 %v2792_v10, %v2792_v10  ;;  %v481_v23 = vmul.f32 %v2795_v11, %v2795_v11 }
  0xa3   : > { %v2802_v26 = vsub.f32 %v2638_v2, %v416_v18  ;;  %v2805_v27 = vsub.f32 %v2645_v5, %v418_v19  ;;  %v511_v30 = vsel %vm317_vm0, %v479_v22, 0.0  ;;  %v517_v35 = vsel %vm317_vm0, %v481_v23, 0.0 }
  0xa4   : > { %512 = vadd.xlane.f32.xlu0 %v511_v30  ;;  %v332_v31 = vpop.xlane.xlu0 %331  ;;  %v335_v34 = vpop.xlane.xlu1 %334 }
  0xa5   : > { %v419_v38 = vmul.f32 0.03125, %v332_v31  ;;  %v420_v39 = vmul.f32 0.03125, %v335_v34  ;;  %v480_v42 = vmul.f32 %v2802_v26, %v2802_v26  ;;  %v482_v43 = vmul.f32 %v2805_v27, %v2805_v27 }
  0xa7   : > { %v2814_v46 = vsub.f32 %v2652_v8, %v419_v38  ;;  %v2817_v47 = vsub.f32 %v2655_v9, %v420_v39  ;;  %v514_v50 = vsel %vm317_vm0, %v480_v42, 0.0  ;;  %v520_v55 = vsel %vm317_vm0, %v482_v43, 0.0 }
  0xa8   : > { %518 = vadd.xlane.f32.xlu0 %v517_v35  ;;  %515 = vadd.xlane.f32.xlu1 %v514_v50  ;;  %v338_v51 = vpop.xlane.xlu0 %337  ;;  %v341_v54 = vpop.xlane.xlu1 %340 }
  0xa9   : > { %v421_v58 = vmul.f32 0.03125, %v338_v51  ;;  %v422_v59 = vmul.f32 0.03125, %v341_v54  ;;  %v483_v62 = vmul.f32 %v2814_v46, %v2814_v46  ;;  %v484_v63 = vmul.f32 %v2817_v47, %v2817_v47 }
  0xab   : > { %v2826_v3 = vsub.f32 %v2662_v12, %v421_v58  ;;  %v2829_v4 = vsub.f32 %v2665_v13, %v422_v59  ;;  %v523_v6 = vsel %vm317_vm0, %v483_v62, 0.0  ;;  %v526_v15 = vsel %vm317_vm0, %v484_v63, 0.0 }
  0xac   : > { %521 = vadd.xlane.f32.xlu1 %v520_v55  ;;  %524 = vadd.xlane.f32.xlu0 %v523_v6  ;;  %v344_v7 = vpop.xlane.xlu0 %343  ;;  %v347_v14 = vpop.xlane.xlu1 %346 }
  0xad   : > { %v423_v18 = vmul.f32 0.03125, %v344_v7  ;;  %v424_v19 = vmul.f32 0.03125, %v347_v14  ;;  %v485_v22 = vmul.f32 %v2826_v3, %v2826_v3  ;;  %v486_v23 = vmul.f32 %v2829_v4, %v2829_v4 }
  0xaf   : > { %v2838_v30 = vsub.f32 %v2672_v16, %v423_v18  ;;  %v2841_v31 = vsub.f32 %v2675_v17, %v424_v19  ;;  %v529_v34 = vsel %vm317_vm0, %v485_v22, 0.0  ;;  %v532_v39 = vsel %vm317_vm0, %v486_v23, 0.0 }
  0xb0   : > { %527 = vadd.xlane.f32.xlu1 %v526_v15  ;;  %530 = vadd.xlane.f32.xlu0 %v529_v34  ;;  %v350_v35 = vpop.xlane.xlu0 %349  ;;  %v353_v38 = vpop.xlane.xlu1 %352 }
  0xb1   : > { %v425_v42 = vmul.f32 0.03125, %v350_v35  ;;  %v426_v43 = vmul.f32 0.03125, %v353_v38  ;;  %v487_v50 = vmul.f32 %v2838_v30, %v2838_v30  ;;  %v488_v51 = vmul.f32 %v2841_v31, %v2841_v31 }
  0xb3   : > { %v2850_v54 = vsub.f32 %v2682_v20, %v425_v42  ;;  %v2853_v55 = vsub.f32 %v2685_v21, %v426_v43  ;;  %v535_v58 = vsel %vm317_vm0, %v487_v50, 0.0  ;;  %v538_v63 = vsel %vm317_vm0, %v488_v51, 0.0 }
  0xb4   : > { %533 = vadd.xlane.f32.xlu1 %v532_v39  ;;  %536 = vadd.xlane.f32.xlu0 %v535_v58  ;;  %v356_v59 = vpop.xlane.xlu0 %355  ;;  %v359_v62 = vpop.xlane.xlu1 %358 }
  0xb5   : > { %v427_v6 = vmul.f32 0.03125, %v356_v59  ;;  %v428_v7 = vmul.f32 0.03125, %v359_v62  ;;  %v489_v14 = vmul.f32 %v2850_v54, %v2850_v54  ;;  %v490_v15 = vmul.f32 %v2853_v55, %v2853_v55 }
  0xb7   : > { %v2862_v18 = vsub.f32 %v2692_v24, %v427_v6  ;;  %v2865_v19 = vsub.f32 %v2695_v25, %v428_v7  ;;  %v541_v22 = vsel %vm317_vm0, %v489_v14, 0.0  ;;  %v544_v35 = vsel %vm317_vm0, %v490_v15, 0.0 }
  0xb8   : > { %539 = vadd.xlane.f32.xlu1 %v538_v63  ;;  %542 = vadd.xlane.f32.xlu0 %v541_v22  ;;  %v362_v23 = vpop.xlane.xlu0 %361  ;;  %v365_v34 = vpop.xlane.xlu1 %364 }
  0xb9   : > { %v429_v38 = vmul.f32 0.03125, %v362_v23  ;;  %v430_v39 = vmul.f32 0.03125, %v365_v34  ;;  %v491_v42 = vmul.f32 %v2862_v18, %v2862_v18  ;;  %v492_v43 = vmul.f32 %v2865_v19, %v2865_v19 }
  0xbb   : > { %v2874_v50 = vsub.f32 %v2702_v28, %v429_v38  ;;  %v2877_v51 = vsub.f32 %v2705_v29, %v430_v39  ;;  %v547_v58 = vsel %vm317_vm0, %v491_v42, 0.0  ;;  %v550_v63 = vsel %vm317_vm0, %v492_v43, 0.0 }
  0xbc   : > { %545 = vadd.xlane.f32.xlu1 %v544_v35  ;;  %548 = vadd.xlane.f32.xlu0 %v547_v58  ;;  %v368_v59 = vpop.xlane.xlu0 %367  ;;  %v371_v62 = vpop.xlane.xlu1 %370 }
  0xbd   : > { %v431_v6 = vmul.f32 0.03125, %v368_v59  ;;  %v432_v7 = vmul.f32 0.03125, %v371_v62  ;;  %v493_v14 = vmul.f32 %v2874_v50, %v2874_v50  ;;  %v494_v15 = vmul.f32 %v2877_v51, %v2877_v51 }
  0xbf   : > { %v2886_v22 = vsub.f32 %v2712_v32, %v431_v6  ;;  %v2889_v23 = vsub.f32 %v2715_v33, %v432_v7  ;;  %v553_v34 = vsel %vm317_vm0, %v493_v14, 0.0  ;;  %v556_v39 = vsel %vm317_vm0, %v494_v15, 0.0 }
  0xc0   : > { %551 = vadd.xlane.f32.xlu1 %v550_v63  ;;  %554 = vadd.xlane.f32.xlu0 %v553_v34  ;;  %v374_v35 = vpop.xlane.xlu0 %373  ;;  %v377_v38 = vpop.xlane.xlu1 %376 }
  0xc1   : > { %v433_v42 = vmul.f32 0.03125, %v374_v35  ;;  %v434_v43 = vmul.f32 0.03125, %v377_v38  ;;  %v495_v58 = vmul.f32 %v2886_v22, %v2886_v22  ;;  %v496_v59 = vmul.f32 %v2889_v23, %v2889_v23 }
  0xc3   : > { %v2898_v62 = vsub.f32 %v2722_v36, %v433_v42  ;;  %v2901_v6 = vsub.f32 %v2725_v37, %v434_v43  ;;  %v559_v63 = vsel %vm317_vm0, %v495_v58, 0.0  ;;  %v562_v15 = vsel %vm317_vm0, %v496_v59, 0.0 }
  0xc4   : > { %557 = vadd.xlane.f32.xlu1 %v556_v39  ;;  %560 = vadd.xlane.f32.xlu0 %v559_v63  ;;  %v380_v7 = vpop.xlane.xlu0 %379  ;;  %v383_v14 = vpop.xlane.xlu1 %382 }
  0xc5   : > { %v435_v34 = vmul.f32 0.03125, %v380_v7  ;;  %v436_v35 = vmul.f32 0.03125, %v383_v14  ;;  %v497_v38 = vmul.f32 %v2898_v62, %v2898_v62  ;;  %v498_v42 = vmul.f32 %v2901_v6, %v2901_v6 }
  0xc7   : > { %v2910_v36 = vsub.f32 %v2732_v40, %v435_v34  ;;  %v2913_v43 = vsub.f32 %v2735_v41, %v436_v35  ;;  %v565_v39 = vsel %vm317_vm0, %v497_v38, 0.0  ;;  %v568_v63 = vsel %vm317_vm0, %v498_v42, 0.0 }
  0xc8   : > { %563 = vadd.xlane.f32.xlu1 %v562_v15  ;;  %566 = vadd.xlane.f32.xlu0 %v565_v39  ;;  %v386_v58 = vpop.xlane.xlu0 %385  ;;  %v389_v59 = vpop.xlane.xlu1 %388 }
  0xc9   : > { %v437_v7 = vmul.f32 0.03125, %v386_v58  ;;  %v438_v14 = vmul.f32 0.03125, %v389_v59  ;;  %v499_v37 = vmul.f32 %v2910_v36, %v2910_v36  ;;  %v500_v34 = vmul.f32 %v2913_v43, %v2913_v43 }
  0xcb   : > { %v2922_v40 = vsub.f32 %v2742_v44, %v437_v7  ;;  %v2925_v35 = vsub.f32 %v2745_v45, %v438_v14  ;;  %v571_v15 = vsel %vm317_vm0, %v499_v37, 0.0  ;;  %v574_v39 = vsel %vm317_vm0, %v500_v34, 0.0 }
  0xcc   : > { %569 = vadd.xlane.f32.xlu1 %v568_v63  ;;  %572 = vadd.xlane.f32.xlu0 %v571_v15  ;;  %v392_v38 = vpop.xlane.xlu0 %391  ;;  %v395_v42 = vpop.xlane.xlu1 %394 }
  0xcd   : > { %v439_v58 = vmul.f32 0.03125, %v392_v38  ;;  %v440_v59 = vmul.f32 0.03125, %v395_v42  ;;  %v501_v41 = vmul.f32 %v2922_v40, %v2922_v40  ;;  %v502_v7 = vmul.f32 %v2925_v35, %v2925_v35 }
  0xcf   : > { %v2934_v44 = vsub.f32 %v2752_v48, %v439_v58  ;;  %v2937_v45 = vsub.f32 %v2755_v49, %v440_v59  ;;  %v577_v37 = vsel %vm317_vm0, %v501_v41, 0.0  ;;  %v580_v34 = vsel %vm317_vm0, %v502_v7, 0.0 }
  0xd0   : > { %575 = vadd.xlane.f32.xlu1 %v574_v39  ;;  %578 = vadd.xlane.f32.xlu0 %v577_v37  ;;  %v398_v63 = vpop.xlane.xlu0 %397  ;;  %v401_v14 = vpop.xlane.xlu1 %400 }
  0xd1   : > { %v441_v15 = vmul.f32 0.03125, %v398_v63  ;;  %v442_v38 = vmul.f32 0.03125, %v401_v14  ;;  %v503_v42 = vmul.f32 %v2934_v44, %v2934_v44  ;;  %v504_v48 = vmul.f32 %v2937_v45, %v2937_v45 }
  0xd3   : > { %v2946_v58 = vsub.f32 %v2762_v52, %v441_v15  ;;  %v2949_v49 = vsub.f32 %v2765_v53, %v442_v38  ;;  %v583_v41 = vsel %vm317_vm0, %v503_v42, 0.0  ;;  %v586_v7 = vsel %vm317_vm0, %v504_v48, 0.0 }
  0xd4   : > { %581 = vadd.xlane.f32.xlu1 %v580_v34  ;;  %584 = vadd.xlane.f32.xlu0 %v583_v41  ;;  %v404_v39 = vpop.xlane.xlu0 %403  ;;  %v407_v59 = vpop.xlane.xlu1 %406 }
  0xd5   : > { %3920 = vst [vmem:[#allocation7_spill] sm:$0xff] %v2949_v49  ;;  %v443_v37 = vmul.f32 0.03125, %v404_v39  ;;  %v444_v63 = vmul.f32 0.03125, %v407_v59  ;;  %v505_v14 = vmul.f32 %v2946_v58, %v2946_v58  ;;  %v506_v52 = vmul.f32 %v2949_v49, %v2949_v49 }
  0xd7   : > { %v2958_v15 = vsub.f32 %v2772_v56, %v443_v37  ;;  %v2961_v53 = vsub.f32 %v2775_v57, %v444_v63  ;;  %v589_v34 = vsel %vm317_vm0, %v505_v14, 0.0  ;;  %v592_v48 = vsel %vm317_vm0, %v506_v52, 0.0 }
  0xd8   : > { %587 = vadd.xlane.f32.xlu1 %v586_v7  ;;  %590 = vadd.xlane.f32.xlu0 %v589_v34  ;;  %v410_v38 = vpop.xlane.xlu0 %409  ;;  %v413_v42 = vpop.xlane.xlu1 %412 }
  0xd9   : > { %3921 = vst [vmem:[#allocation8_spill] sm:$0xff] %v2958_v15  ;;  %3922 = vst [vmem:[#allocation9_spill] sm:$0xff] %v2961_v53  ;;  %v445_v41 = vmul.f32 0.03125, %v410_v38  ;;  %v446_v39 = vmul.f32 0.03125, %v413_v42  ;;  %v507_v59 = vmul.f32 %v2958_v15, %v2958_v15  ;;  %v508_v56 = vmul.f32 %v2961_v53, %v2961_v53 }
  0xdb   : > { %v2970_v37 = vsub.f32 %v2782_v60, %v445_v41  ;;  %v2973_v57 = vsub.f32 %v2785_v61, %v446_v39  ;;  %v595_v7 = vsel %vm317_vm0, %v507_v59, 0.0  ;;  %v598_v63 = vsel %vm317_vm0, %v508_v56, 0.0 }
  0xdc   : > { %593 = vadd.xlane.f32.xlu1 %v592_v48  ;;  %596 = vadd.xlane.f32.xlu0 %v595_v7 }
  0xdd   : > { %3923 = vst [vmem:[#allocation10_spill] sm:$0xff] %v2970_v37  ;;  %3924 = vst [vmem:[#allocation11_spill] sm:$0xff] %v2973_v57  ;;  %v509_v14 = vmul.f32 %v2970_v37, %v2970_v37  ;;  %v510_v52 = vmul.f32 %v2973_v57, %v2973_v57 }
  0xdf   : > { %v601_v34 = vsel %vm317_vm0, %v509_v14, 0.0  ;;  %v604_v60 = vsel %vm317_vm0, %v510_v52, 0.0 }
  0xe0   : > { %599 = vadd.xlane.f32.xlu1 %v598_v63  ;;  %602 = vadd.xlane.f32.xlu0 %v601_v34 }
  0xe4   : > { %605 = vadd.xlane.f32.xlu1 %v604_v60 }
 0x12d   : > { %v513_v61 = vpop.xlane.xlu0 %512 }
 0x12e   : > { %v607_v38 = vmul.f32 0.03125, %v513_v61 }
 0x130   : > { %v639_v42 = vadd.f32 1e-05, %v607_v38 }
 0x131   : > { %v516_v48 = vpop.xlane.xlu1 %515  ;;  %v519_v41 = vpop.xlane.xlu0 %518 }
 0x132   : > { %2364 = vrsqrt.f32 %v639_v42  ;;  %v608_v39 = vmul.f32 0.03125, %v516_v48  ;;  %v609_v59 = vmul.f32 0.03125, %v519_v41 }
 0x134   : > { %v640_v56 = vadd.f32 1e-05, %v608_v39  ;;  %v641_v7 = vadd.f32 1e-05, %v609_v59 }
 0x135   : > { %v522_v37 = vpop.xlane.xlu1 %521  ;;  %v525_v53 = vpop.xlane.xlu0 %524 }
 0x136   : > { %2366 = vrsqrt.f32 %v640_v56  ;;  %v610_v57 = vmul.f32 0.03125, %v522_v37  ;;  %v611_v14 = vmul.f32 0.03125, %v525_v53  ;;  %v2986_v53 = vld [vmem:[%s3877_s1] ss:$0 sm:$0xff] }
 0x137   : > { %2368 = vrsqrt.f32 %v641_v7 }
 0x138   : > { %v642_v63 = vadd.f32 1e-05, %v610_v57  ;;  %v643_v34 = vadd.f32 1e-05, %v611_v14 }
 0x139   : > { %v528_v52 = vpop.xlane.xlu1 %527  ;;  %v531_v60 = vpop.xlane.xlu0 %530 }
 0x13a   : > { %2370 = vrsqrt.f32 %v642_v63  ;;  %v612_v61 = vmul.f32 0.03125, %v528_v52  ;;  %v613_v38 = vmul.f32 0.03125, %v531_v60  ;;  %v2993_v60 = vld [vmem:[%s3878_s2] ss:$0 sm:$0xff] }
 0x13b   : > { %2372 = vrsqrt.f32 %v643_v34 }
 0x13c   : > { %v644_v15 = vadd.f32 1e-05, %v612_v61  ;;  %v645_v42 = vadd.f32 1e-05, %v613_v38 }
 0x13d   : > { %v534_v48 = vpop.xlane.xlu1 %533  ;;  %v537_v41 = vpop.xlane.xlu0 %536 }
 0x13e   : > { %2374 = vrsqrt.f32 %v644_v15  ;;  %v614_v39 = vmul.f32 0.03125, %v534_v48  ;;  %v615_v59 = vmul.f32 0.03125, %v537_v41 }
 0x13f   : > { %v2365_v49 = vpop.eup %2364  ;;  %2376 = vrsqrt.f32 %v645_v42 }
 0x140   : > { %v646_v37 = vadd.f32 1e-05, %v614_v39  ;;  %v647_v57 = vadd.f32 1e-05, %v615_v59  ;;  %v703_v56 = vmul.f32 %v2365_v49, %v2792_v10 }
 0x141   : > { %v540_v7 = vpop.xlane.xlu1 %539  ;;  %v543_v14 = vpop.xlane.xlu0 %542 }
 0x142   : > { %2378 = vrsqrt.f32 %v646_v37  ;;  %v616_v63 = vmul.f32 0.03125, %v540_v7  ;;  %v617_v34 = vmul.f32 0.03125, %v543_v14  ;;  %v741_v15 = vmul.f32 %v2986_v53, %v703_v56 }
 0x143   : > { %v2367_v52 = vpop.eup %2366  ;;  %2380 = vrsqrt.f32 %v647_v57 }
 0x144   : > { %v2369_v61 = vpop.eup %2368  ;;  %v648_v38 = vadd.f32 1e-05, %v616_v63  ;;  %v649_v42 = vadd.f32 1e-05, %v617_v34  ;;  %v773_v48 = vadd.f32 %v741_v15, %v2632_v0  ;;  %v704_v10 = vmul.f32 %v2367_v52, %v2802_v26 }
 0x145   : > { %v546_v49 = vpop.xlane.xlu1 %545  ;;  %v549_v41 = vpop.xlane.xlu0 %548  ;;  %v705_v39 = vmul.f32 %v2369_v61, %v2795_v11 }
 0x146   : > { %2382 = vrsqrt.f32 %v648_v38  ;;  %v618_v59 = vmul.f32 0.03125, %v546_v49  ;;  %v619_v37 = vmul.f32 0.03125, %v549_v41  ;;  %v2999_v57 = vadd.f32 %v2993_v60, %v773_v48 }
 0x147   : > { %v2371_v56 = vpop.eup %2370  ;;  %2384 = vrsqrt.f32 %v649_v42  ;;  %v742_v7 = vmul.f32 %v2986_v53, %v704_v10  ;;  %v743_v14 = vmul.f32 %v2986_v53, %v705_v39 }
 0x148   : > { %v2373_v63 = vpop.eup %2372  ;;  %v650_v0 = vadd.f32 1e-05, %v618_v59  ;;  %v651_v34 = vadd.f32 1e-05, %v619_v37  ;;  %v843_v26 = vsel %vm317_vm0, %v2999_v57, 0.0  ;;  %v706_v11 = vmul.f32 %v2371_v56, %v2805_v27 }
 0x149   : > { %v552_v15 = vpop.xlane.xlu1 %551  ;;  %844 = vadd.xlane.f32.xlu0 %v843_v26  ;;  %v555_v52 = vpop.xlane.xlu0 %554  ;;  %v774_v61 = vadd.f32 %v742_v7, %v2638_v2  ;;  %v775_v38 = vadd.f32 %v743_v14, %v2635_v1  ;;  %v707_v42 = vmul.f32 %v2373_v63, %v2814_v46 }
 0x14a   : > { %2386 = vrsqrt.f32 %v650_v0  ;;  %v620_v48 = vmul.f32 0.03125, %v552_v15  ;;  %v621_v10 = vmul.f32 0.03125, %v555_v52  ;;  %v744_v49 = vmul.f32 %v2986_v53, %v706_v11 }
 0x14b   : > { %v2375_v41 = vpop.eup %2374  ;;  %2388 = vrsqrt.f32 %v651_v34  ;;  %v3011_v39 = vadd.f32 %v2993_v60, %v774_v61  ;;  %v3014_v27 = vadd.f32 %v2993_v60, %v775_v38  ;;  %v745_v59 = vmul.f32 %v2986_v53, %v707_v42 }
 0x14c   : > { %v2377_v2 = vpop.eup %2376  ;;  %v652_v37 = vadd.f32 1e-05, %v620_v48  ;;  %v653_v1 = vadd.f32 1e-05, %v621_v10  ;;  %v776_v46 = vadd.f32 %v744_v49, %v2645_v5  ;;  %v708_v56 = vmul.f32 %v2375_v41, %v2817_v47 }
 0x14d   : > { %v846_v7 = vsel %vm317_vm0, %v3011_v39, 0.0  ;;  %v558_v14 = vpop.xlane.xlu1 %557  ;;  %v849_v63 = vsel %vm317_vm0, %v3014_v27, 0.0  ;;  %v561_v0 = vpop.xlane.xlu0 %560  ;;  %v777_v34 = vadd.f32 %v745_v59, %v2652_v8  ;;  %v709_v26 = vmul.f32 %v2377_v2, %v2826_v3 }
 0x14e   : > { %2390 = vrsqrt.f32 %v652_v37  ;;  %847 = vadd.xlane.f32.xlu1 %v846_v7  ;;  %v622_v11 = vmul.f32 0.03125, %v558_v14  ;;  %850 = vadd.xlane.f32.xlu0 %v849_v63  ;;  %v623_v15 = vmul.f32 0.03125, %v561_v0  ;;  %v3026_v5 = vadd.f32 %v2993_v60, %v776_v46 }
 0x14f   : > { %v2379_v47 = vpop.eup %2378  ;;  %2392 = vrsqrt.f32 %v653_v1  ;;  %v3029_v52 = vadd.f32 %v2993_v60, %v777_v34  ;;  %v746_v61 = vmul.f32 %v2986_v53, %v708_v56  ;;  %v747_v38 = vmul.f32 %v2986_v53, %v709_v26 }
 0x150   : > { %v2381_v8 = vpop.eup %2380  ;;  %v654_v42 = vadd.f32 1e-05, %v622_v11  ;;  %v655_v3 = vadd.f32 1e-05, %v623_v15  ;;  %v852_v48 = vsel %vm317_vm0, %v3026_v5, 0.0  ;;  %v710_v10 = vmul.f32 %v2379_v47, %v2829_v4 }
 0x151   : > { %v564_v49 = vpop.xlane.xlu1 %563  ;;  %v855_v41 = vsel %vm317_vm0, %v3029_v52, 0.0  ;;  %v567_v59 = vpop.xlane.xlu0 %566  ;;  %v778_v2 = vadd.f32 %v746_v61, %v2655_v9  ;;  %v779_v37 = vadd.f32 %v747_v38, %v2662_v12  ;;  %v711_v1 = vmul.f32 %v2381_v8, %v2838_v30 }
 0x152   : > { %2394 = vrsqrt.f32 %v654_v42  ;;  %853 = vadd.xlane.f32.xlu1 %v852_v48  ;;  %v624_v46 = vmul.f32 0.03125, %v564_v49  ;;  %856 = vadd.xlane.f32.xlu0 %v855_v41  ;;  %v625_v56 = vmul.f32 0.03125, %v567_v59  ;;  %v748_v7 = vmul.f32 %v2986_v53, %v710_v10 }
 0x153   : > { %v2383_v14 = vpop.eup %2382  ;;  %2396 = vrsqrt.f32 %v655_v3  ;;  %v3043_v4 = vadd.f32 %v2993_v60, %v778_v2  ;;  %v3046_v63 = vadd.f32 %v2993_v60, %v779_v37  ;;  %v749_v9 = vmul.f32 %v2986_v53, %v711_v1 }
 0x154   : > { %v2385_v12 = vpop.eup %2384  ;;  %v656_v0 = vadd.f32 1e-05, %v624_v46  ;;  %v657_v30 = vadd.f32 1e-05, %v625_v56  ;;  %v780_v34 = vadd.f32 %v748_v7, %v2665_v13  ;;  %v712_v26 = vmul.f32 %v2383_v14, %v2841_v31 }
 0x155   : > { %v858_v11 = vsel %vm317_vm0, %v3043_v4, 0.0  ;;  %v570_v15 = vpop.xlane.xlu1 %569  ;;  %v861_v47 = vsel %vm317_vm0, %v3046_v63, 0.0  ;;  %v573_v61 = vpop.xlane.xlu0 %572  ;;  %v781_v38 = vadd.f32 %v749_v9, %v2672_v16  ;;  %v713_v8 = vmul.f32 %v2385_v12, %v2850_v54 }
 0x156   : > { %2398 = vrsqrt.f32 %v656_v0  ;;  %859 = vadd.xlane.f32.xlu1 %v858_v11  ;;  %v626_v42 = vmul.f32 0.03125, %v570_v15  ;;  %862 = vadd.xlane.f32.xlu0 %v861_v47  ;;  %v627_v3 = vmul.f32 0.03125, %v573_v61  ;;  %v3058_v13 = vadd.f32 %v2993_v60, %v780_v34 }
 0x157   : > { %v2387_v31 = vpop.eup %2386  ;;  %2400 = vrsqrt.f32 %v657_v30  ;;  %v3061_v48 = vadd.f32 %v2993_v60, %v781_v38  ;;  %v750_v10 = vmul.f32 %v2986_v53, %v712_v26  ;;  %v751_v49 = vmul.f32 %v2986_v53, %v713_v8 }
 0x158   : > { %v2389_v16 = vpop.eup %2388  ;;  %v658_v41 = vadd.f32 1e-05, %v626_v42  ;;  %v659_v54 = vadd.f32 1e-05, %v627_v3  ;;  %v864_v59 = vsel %vm317_vm0, %v3058_v13, 0.0  ;;  %v714_v2 = vmul.f32 %v2387_v31, %v2853_v55 }
 0x159   : > { %v576_v37 = vpop.xlane.xlu1 %575  ;;  %v867_v1 = vsel %vm317_vm0, %v3061_v48, 0.0  ;;  %v579_v46 = vpop.xlane.xlu0 %578  ;;  %v782_v56 = vadd.f32 %v750_v10, %v2675_v17  ;;  %v783_v7 = vadd.f32 %v751_v49, %v2682_v20  ;;  %v715_v14 = vmul.f32 %v2389_v16, %v2862_v18 }
 0x15a   : > { %2402 = vrsqrt.f32 %v658_v41  ;;  %865 = vadd.xlane.f32.xlu1 %v864_v59  ;;  %v628_v9 = vmul.f32 0.03125, %v576_v37  ;;  %868 = vadd.xlane.f32.xlu0 %v867_v1  ;;  %v629_v12 = vmul.f32 0.03125, %v579_v46  ;;  %v752_v0 = vmul.f32 %v2986_v53, %v714_v2 }
 0x15b   : > { %v2391_v30 = vpop.eup %2390  ;;  %2404 = vrsqrt.f32 %v659_v54  ;;  %v3075_v55 = vadd.f32 %v2993_v60, %v782_v56  ;;  %v3078_v34 = vadd.f32 %v2993_v60, %v783_v7  ;;  %v753_v17 = vmul.f32 %v2986_v53, %v715_v14 }
 0x15c   : > { %v2393_v20 = vpop.eup %2392  ;;  %v660_v26 = vadd.f32 1e-05, %v628_v9  ;;  %v661_v18 = vadd.f32 1e-05, %v629_v12  ;;  %v784_v11 = vadd.f32 %v752_v0, %v2685_v21  ;;  %v716_v15 = vmul.f32 %v2391_v30, %v2865_v19 }
 0x15d   : > { %3925 = vst [vmem:[#allocation12_spill] sm:$0xff] %v3075_v55  ;;  %v870_v47 = vsel %vm317_vm0, %v3075_v55, 0.0  ;;  %v582_v61 = vpop.xlane.xlu1 %581  ;;  %v873_v38 = vsel %vm317_vm0, %v3078_v34, 0.0  ;;  %v585_v8 = vpop.xlane.xlu0 %584  ;;  %v785_v42 = vadd.f32 %v753_v17, %v2692_v24  ;;  %v717_v3 = vmul.f32 %v2393_v20, %v2874_v50 }
 0x15e   : > { %2406 = vrsqrt.f32 %v660_v26  ;;  %871 = vadd.xlane.f32.xlu1 %v870_v47  ;;  %v630_v31 = vmul.f32 0.03125, %v582_v61  ;;  %874 = vadd.xlane.f32.xlu0 %v873_v38  ;;  %v631_v10 = vmul.f32 0.03125, %v585_v8  ;;  %v3090_v21 = vadd.f32 %v2993_v60, %v784_v11 }
 0x15f   : > { %v2395_v19 = vpop.eup %2394  ;;  %2408 = vrsqrt.f32 %v661_v18  ;;  %v3093_v49 = vadd.f32 %v2993_v60, %v785_v42  ;;  %v754_v16 = vmul.f32 %v2986_v53, %v716_v15  ;;  %v755_v41 = vmul.f32 %v2986_v53, %v717_v3 }
 0x160   : > { %v2397_v24 = vpop.eup %2396  ;;  %v662_v54 = vadd.f32 1e-05, %v630_v31  ;;  %v663_v50 = vadd.f32 1e-05, %v631_v10  ;;  %v876_v59 = vsel %vm317_vm0, %v3090_v21, 0.0  ;;  %v718_v2 = vmul.f32 %v2395_v19, %v2877_v51 }
 0x161   : > { %3926 = vst [vmem:[#allocation13_spill] sm:$0xff] %v3093_v49  ;;  %v588_v37 = vpop.xlane.xlu1 %587  ;;  %v879_v1 = vsel %vm317_vm0, %v3093_v49, 0.0  ;;  %v591_v46 = vpop.xlane.xlu0 %590  ;;  %v786_v56 = vadd.f32 %v754_v16, %v2695_v25  ;;  %v787_v7 = vadd.f32 %v755_v41, %v2702_v28  ;;  %v719_v14 = vmul.f32 %v2397_v24, %v2886_v22 }
 0x162   : > { %2410 = vrsqrt.f32 %v662_v54  ;;  %877 = vadd.xlane.f32.xlu1 %v876_v59  ;;  %v632_v9 = vmul.f32 0.03125, %v588_v37  ;;  %880 = vadd.xlane.f32.xlu0 %v879_v1  ;;  %v633_v12 = vmul.f32 0.03125, %v591_v46  ;;  %v756_v0 = vmul.f32 %v2986_v53, %v718_v2  ;;  %v3931_v37 = vld [vmem:[#allocation2_spill] sm:$0xff] }
 0x163   : > { %v2399_v30 = vpop.eup %2398  ;;  %2412 = vrsqrt.f32 %v663_v50  ;;  %v3107_v51 = vadd.f32 %v2993_v60, %v786_v56  ;;  %v3110_v17 = vadd.f32 %v2993_v60, %v787_v7  ;;  %v757_v25 = vmul.f32 %v2986_v53, %v719_v14 }
 0x164   : > { %v2401_v28 = vpop.eup %2400  ;;  %v664_v20 = vadd.f32 1e-05, %v632_v9  ;;  %v665_v22 = vadd.f32 1e-05, %v633_v12  ;;  %v788_v26 = vadd.f32 %v756_v0, %v2705_v29  ;;  %v720_v18 = vmul.f32 %v2399_v30, %v2889_v23 }
 0x165   : > { %3927 = vst [vmem:[#allocation14_spill] sm:$0xff] %v3107_v51  ;;  %3928 = vst [vmem:[#allocation15_spill] sm:$0xff] %v3110_v17  ;;  %v882_v11 = vsel %vm317_vm0, %v3107_v51, 0.0  ;;  %v594_v15 = vpop.xlane.xlu1 %593  ;;  %v885_v47 = vsel %vm317_vm0, %v3110_v17, 0.0  ;;  %v597_v61 = vpop.xlane.xlu0 %596  ;;  %v789_v38 = vadd.f32 %v757_v25, %v2712_v32  ;;  %v721_v8 = vmul.f32 %v2401_v28, %v2898_v62  ;;  %v3934_v25 = vld [vmem:[#allocation3_spill] sm:$0xff] }
 0x166   : > { %2414 = vrsqrt.f32 %v664_v20  ;;  %883 = vadd.xlane.f32.xlu1 %v882_v11  ;;  %v634_v42 = vmul.f32 0.03125, %v594_v15  ;;  %886 = vadd.xlane.f32.xlu0 %v885_v47  ;;  %v635_v3 = vmul.f32 0.03125, %v597_v61  ;;  %v3122_v29 = vadd.f32 %v2993_v60, %v788_v26  ;;  %v3935_v11 = vld [vmem:[#allocation4_spill] sm:$0xff] }
 0x167   : > { %v2403_v23 = vpop.eup %2402  ;;  %2416 = vrsqrt.f32 %v665_v22  ;;  %v3125_v31 = vadd.f32 %v2993_v60, %v789_v38  ;;  %v758_v10 = vmul.f32 %v2986_v53, %v720_v18  ;;  %v759_v19 = vmul.f32 %v2986_v53, %v721_v8 }
 0x168   : > { %3929 = vst [vmem:[#allocation16_spill] sm:$0xff] %v3122_v29  ;;  %v2405_v32 = vpop.eup %2404  ;;  %v666_v16 = vadd.f32 1e-05, %v634_v42  ;;  %v667_v62 = vadd.f32 1e-05, %v635_v3  ;;  %v888_v41 = vsel %vm317_vm0, %v3122_v29, 0.0  ;;  %v722_v24 = vmul.f32 %v2403_v23, %v2901_v6 }
 0x169   : > { %3930 = vst [vmem:[#allocation17_spill] sm:$0xff] %v3125_v31  ;;  %v600_v54 = vpop.xlane.xlu1 %599  ;;  %v891_v50 = vsel %vm317_vm0, %v3125_v31, 0.0  ;;  %v603_v59 = vpop.xlane.xlu0 %602  ;;  %v790_v2 = vadd.f32 %v758_v10, %v2715_v33  ;;  %v791_v1 = vadd.f32 %v759_v19, %v3931_v37  ;;  %v723_v46 = vmul.f32 %v2405_v32, %v2910_v36  ;;  %v3938_v19 = vld [vmem:[#allocation5_spill] sm:$0xff] }
 0x16a   : > { %2418 = vrsqrt.f32 %v666_v16  ;;  %889 = vadd.xlane.f32.xlu1 %v888_v41  ;;  %v636_v56 = vmul.f32 0.03125, %v600_v54  ;;  %892 = vadd.xlane.f32.xlu0 %v891_v50  ;;  %v637_v7 = vmul.f32 0.03125, %v603_v59  ;;  %v760_v14 = vmul.f32 %v2986_v53, %v722_v24  ;;  %v3939_v41 = vld [vmem:[#allocation6_spill] sm:$0xff] }
 0x16b   : > { %v2407_v9 = vpop.eup %2406  ;;  %2420 = vrsqrt.f32 %v667_v62  ;;  %v3139_v6 = vadd.f32 %v2993_v60, %v790_v2  ;;  %v3142_v12 = vadd.f32 %v2993_v60, %v791_v1  ;;  %v761_v33 = vmul.f32 %v2986_v53, %v723_v46 }
 0x16c   : > { %v2409_v0 = vpop.eup %2408  ;;  %v668_v30 = vadd.f32 1e-05, %v636_v56  ;;  %v669_v36 = vadd.f32 1e-05, %v637_v7  ;;  %v792_v28 = vadd.f32 %v760_v14, %v3934_v25  ;;  %v724_v20 = vmul.f32 %v2407_v9, %v2913_v43  ;;  %v2556_v56 = vld [vmem:[%s2629_s30 + $0xb8] sm:$0xff]  ;;  %v2557_v9 = vld [vmem:[%s2629_s30 + $0xc0] sm:$0xff] }
 0x16d   : > { %3932 = vst [vmem:[#allocation2_spill] sm:$0xff] %v3139_v6  ;;  %3933 = vst [vmem:[#allocation18_spill] sm:$0xff] %v3142_v12  ;;  %v894_v22 = vsel %vm317_vm0, %v3139_v6, 0.0  ;;  %v606_v26 = vpop.xlane.xlu1 %605  ;;  %v897_v18 = vsel %vm317_vm0, %v3142_v12, 0.0  ;;  %v793_v15 = vadd.f32 %v761_v33, %v3935_v11  ;;  %v725_v47 = vmul.f32 %v2409_v0, %v2922_v40 }
 0x16e   : > { %2422 = vrsqrt.f32 %v668_v30  ;;  %895 = vadd.xlane.f32.xlu1 %v894_v22  ;;  %v638_v61 = vmul.f32 0.03125, %v606_v26  ;;  %898 = vadd.xlane.f32.xlu0 %v897_v18  ;;  %v3154_v38 = vadd.f32 %v2993_v60, %v792_v28  ;;  %v762_v43 = vmul.f32 %v2986_v53, %v724_v20  ;;  %v2558_v26 = vld [vmem:[%s2629_s30 + $0xc8] sm:$0xff] }
 0x16f   : > { %v2411_v8 = vpop.eup %2410  ;;  %2424 = vrsqrt.f32 %v669_v36  ;;  %v3158_v42 = vadd.f32 %v2993_v60, %v793_v15  ;;  %v763_v3 = vmul.f32 %v2986_v53, %v725_v47  ;;  %v3944_v18 = vld [vmem:[#allocation7_spill] sm:$0xff]  ;;  %v2559_v47 = vld [vmem:[%s2629_s30 + $0xd0] sm:$0xff] }
 0x170   : > { %3936 = vst [vmem:[#allocation3_spill] sm:$0xff] %v3154_v38  ;;  %v2413_v23 = vpop.eup %2412  ;;  %v670_v10 = vadd.f32 1e-05, %v638_v61  ;;  %v900_v40 = vsel %vm317_vm0, %v3154_v38, 0.0  ;;  %v794_v32 = vadd.f32 %v762_v43, %v3938_v19  ;;  %v726_v16 = vmul.f32 %v2411_v8, %v2925_v35  ;;  %v3945_v43 = vld [vmem:[#allocation8_spill] sm:$0xff] }
 0x171   : > { %3937 = vst [vmem:[#allocation4_spill] sm:$0xff] %v3158_v42  ;;  %v903_v62 = vsel %vm317_vm0, %v3158_v42, 0.0  ;;  %v795_v24 = vadd.f32 %v763_v3, %v3939_v41  ;;  %v727_v54 = vmul.f32 %v2413_v23, %v2934_v44 }
 0x172   : > { %2426 = vrsqrt.f32 %v670_v10  ;;  %901 = vadd.xlane.f32.xlu1 %v900_v40  ;;  %904 = vadd.xlane.f32.xlu0 %v903_v62  ;;  %v3170_v50 = vadd.f32 %v2993_v60, %v794_v32  ;;  %v764_v59 = vmul.f32 %v2986_v53, %v726_v16  ;;  %v2560_v62 = vld [vmem:[%s2629_s30 + $0xd8] sm:$0xff] }
 0x173   : > { %v2415_v2 = vpop.eup %2414  ;;  %v3174_v37 = vadd.f32 %v2993_v60, %v795_v24  ;;  %v765_v35 = vmul.f32 %v2986_v53, %v727_v54  ;;  %v3948_v24 = vld [vmem:[#allocation9_spill] sm:$0xff] }
 0x174   : > { %3940 = vst [vmem:[#allocation5_spill] sm:$0xff] %v3170_v50  ;;  %v2417_v1 = vpop.eup %2416  ;;  %v906_v46 = vsel %vm317_vm0, %v3170_v50, 0.0  ;;  %v796_v44 = vadd.f32 %v2556_v56, %v764_v59  ;;  %v728_v7 = vmul.f32 %v2415_v2, %v2937_v45  ;;  %v2561_v2 = vld [vmem:[%s2629_s30 + $0xe0] sm:$0xff] }
 0x175   : > { %3941 = vst [vmem:[#allocation6_spill] sm:$0xff] %v3174_v37  ;;  %v909_v14 = vsel %vm317_vm0, %v3174_v37, 0.0  ;;  %v797_v33 = vadd.f32 %v2557_v9, %v765_v35  ;;  %v729_v0 = vmul.f32 %v2417_v1, %v2946_v58  ;;  %v3949_v1 = vld [vmem:[#allocation10_spill] sm:$0xff] }
 0x176   : > { %907 = vadd.xlane.f32.xlu1 %v906_v46  ;;  %910 = vadd.xlane.f32.xlu0 %v909_v14  ;;  %v3186_v30 = vadd.f32 %v2993_v60, %v796_v44  ;;  %v766_v36 = vmul.f32 %v2986_v53, %v728_v7 }
 0x177   : > { %v2419_v25 = vpop.eup %2418  ;;  %v3190_v28 = vadd.f32 %v2993_v60, %v797_v33  ;;  %v767_v45 = vmul.f32 %v2986_v53, %v729_v0  ;;  %v2562_v0 = vld [vmem:[%s2629_s30 + $0xe8] sm:$0xff] }
 0x178   : > { %3942 = vst [vmem:[#allocation19_spill] sm:$0xff] %v3186_v30  ;;  %v2421_v20 = vpop.eup %2420  ;;  %v912_v22 = vsel %vm317_vm0, %v3186_v30, 0.0  ;;  %v798_v58 = vadd.f32 %v2558_v26, %v766_v36  ;;  %v730_v11 = vmul.f32 %v2419_v25, %v3944_v18  ;;  %v3952_v25 = vld [vmem:[#allocation11_spill] sm:$0xff] }
 0x179   : > { %3943 = vst [vmem:[#allocation20_spill] sm:$0xff] %v3190_v28  ;;  %v915_v15 = vsel %vm317_vm0, %v3190_v28, 0.0  ;;  %v799_v61 = vadd.f32 %v2559_v47, %v767_v45  ;;  %v731_v8 = vmul.f32 %v2421_v20, %v3945_v43  ;;  %v2564_v47 = vld [vmem:[%s2629_s30 + $0xf8] sm:$0xff] }
 0x17a   : > { %913 = vadd.xlane.f32.xlu1 %v912_v22  ;;  %916 = vadd.xlane.f32.xlu0 %v915_v15  ;;  %v3202_v3 = vadd.f32 %v2993_v60, %v798_v58  ;;  %v768_v23 = vmul.f32 %v2986_v53, %v730_v11  ;;  %v2563_v22 = vld [vmem:[%s2629_s30 + $0xf0] sm:$0xff] }
 0x17b   : > { %v2423_v10 = vpop.eup %2422  ;;  %v3206_v40 = vadd.f32 %v2993_v60, %v799_v61  ;;  %v769_v19 = vmul.f32 %v2986_v53, %v731_v8 }
 0x17c   : > { %3946 = vst [vmem:[#allocation7_spill] sm:$0xff] %v3202_v3  ;;  %v2425_v32 = vpop.eup %2424  ;;  %v918_v16 = vsel %vm317_vm0, %v3202_v3, 0.0  ;;  %v800_v41 = vadd.f32 %v2560_v62, %v768_v23  ;;  %v732_v54 = vmul.f32 %v2423_v10, %v3948_v24 }
 0x17d   : > { %3947 = vst [vmem:[#allocation8_spill] sm:$0xff] %v3206_v40  ;;  %v921_v59 = vsel %vm317_vm0, %v3206_v40, 0.0  ;;  %v801_v35 = vadd.f32 %v2561_v2, %v769_v19  ;;  %v733_v46 = vmul.f32 %v2425_v32, %v3949_v1 }
 0x17e   : > { %919 = vadd.xlane.f32.xlu1 %v918_v16  ;;  %922 = vadd.xlane.f32.xlu0 %v921_v59  ;;  %v3218_v56 = vadd.f32 %v2993_v60, %v800_v41  ;;  %v770_v44 = vmul.f32 %v2986_v53, %v732_v54 }
 0x17f   : > { %v2427_v7 = vpop.eup %2426  ;;  %v3222_v14 = vadd.f32 %v2993_v60, %v801_v35  ;;  %v771_v9 = vmul.f32 %v2986_v53, %v733_v46 }
 0x180   : > { %3950 = vst [vmem:[#allocation9_spill] sm:$0xff] %v3218_v56  ;;  %v924_v33 = vsel %vm317_vm0, %v3218_v56, 0.0  ;;  %v802_v36 = vadd.f32 %v2562_v0, %v770_v44  ;;  %v734_v45 = vmul.f32 %v2427_v7, %v3952_v25 }
 0x181   : > { %3951 = vst [vmem:[#allocation10_spill] sm:$0xff] %v3222_v14  ;;  %v927_v20 = vsel %vm317_vm0, %v3222_v14, 0.0  ;;  %v803_v26 = vadd.f32 %v2563_v22, %v771_v9 }
 0x182   : > { %925 = vadd.xlane.f32.xlu1 %v924_v33  ;;  %928 = vadd.xlane.f32.xlu0 %v927_v20  ;;  %v3233_v58 = vadd.f32 %v2993_v60, %v802_v36  ;;  %v772_v18 = vmul.f32 %v2986_v53, %v734_v45 }
 0x183   : > { %v3237_v11 = vadd.f32 %v2993_v60, %v803_v26 }
 0x184   : > { %3953 = vst [vmem:[#allocation11_spill] sm:$0xff] %v3233_v58  ;;  %v930_v15 = vsel %vm317_vm0, %v3233_v58, 0.0  ;;  %v804_v61 = vadd.f32 %v2564_v47, %v772_v18 }
 0x185   : > { %3954 = vst [vmem:[#allocation21_spill] sm:$0xff] %v3237_v11  ;;  %v933_v43 = vsel %vm317_vm0, %v3237_v11, 0.0 }
 0x186   : > { %931 = vadd.xlane.f32.xlu1 %v930_v15  ;;  %934 = vadd.xlane.f32.xlu0 %v933_v43  ;;  %v3245_v8 = vadd.f32 %v2993_v60, %v804_v61 }
 0x188   : > { %3955 = vst [vmem:[#allocation22_spill] sm:$0xff] %v3245_v8  ;;  %v936_v23 = vsel %vm317_vm0, %v3245_v8, 0.0 }
 0x18a   : > { %937 = vadd.xlane.f32.xlu1 %v936_v23 }
 0x1d2   : > { %v845_v53 = vpop.xlane.xlu0 %844 }
 0x1d3   : > { %v939_v10 = vmul.f32 0.03125, %v845_v53 }
 0x1d5   : > { %v3250_v19 = vsub.f32 %v2999_v57, %v939_v10 }
 0x1d7   : > { %v848_v32 = vpop.xlane.xlu1 %847  ;;  %v851_v16 = vpop.xlane.xlu0 %850  ;;  %v1003_v62 = vmul.f32 %v3250_v19, %v3250_v19 }
 0x1d8   : > { %v940_v41 = vmul.f32 0.03125, %v848_v32  ;;  %v941_v24 = vmul.f32 0.03125, %v851_v16 }
 0x1d9   : > { %v1035_v54 = vsel %vm317_vm0, %v1003_v62, 0.0 }
 0x1da   : > { %v3256_v60 = vsub.f32 %v3011_v39, %v940_v41  ;;  %v3259_v59 = vsub.f32 %v3014_v27, %v941_v24  ;;  %1036 = vadd.xlane.f32.xlu0 %v1035_v54 }
 0x1db   : > { %v854_v2 = vpop.xlane.xlu1 %853  ;;  %v857_v35 = vpop.xlane.xlu0 %856 }
 0x1dc   : > { %v942_v1 = vmul.f32 0.03125, %v854_v2  ;;  %v943_v46 = vmul.f32 0.03125, %v857_v35  ;;  %v1004_v44 = vmul.f32 %v3256_v60, %v3256_v60  ;;  %v1005_v7 = vmul.f32 %v3259_v59, %v3259_v59 }
 0x1de   : > { %v3266_v9 = vsub.f32 %v3026_v5, %v942_v1  ;;  %v3269_v33 = vsub.f32 %v3029_v52, %v943_v46  ;;  %v1038_v0 = vsel %vm317_vm0, %v1004_v44, 0.0  ;;  %v1041_v36 = vsel %vm317_vm0, %v1005_v7, 0.0 }
 0x1df   : > { %1039 = vadd.xlane.f32.xlu1 %v1038_v0  ;;  %v860_v25 = vpop.xlane.xlu1 %859  ;;  %1042 = vadd.xlane.f32.xlu0 %v1041_v36  ;;  %v863_v45 = vpop.xlane.xlu0 %862 }
 0x1e0   : > { %v944_v20 = vmul.f32 0.03125, %v860_v25  ;;  %v945_v22 = vmul.f32 0.03125, %v863_v45  ;;  %v1006_v26 = vmul.f32 %v3266_v9, %v3266_v9  ;;  %v1007_v18 = vmul.f32 %v3269_v33, %v3269_v33 }
 0x1e2   : > { %v3278_v15 = vsub.f32 %v3043_v4, %v944_v20  ;;  %v3281_v47 = vsub.f32 %v3046_v63, %v945_v22  ;;  %v1044_v61 = vsel %vm317_vm0, %v1006_v26, 0.0  ;;  %v1047_v43 = vsel %vm317_vm0, %v1007_v18, 0.0 }
 0x1e3   : > { %1045 = vadd.xlane.f32.xlu1 %v1044_v61  ;;  %v866_v23 = vpop.xlane.xlu1 %865  ;;  %1048 = vadd.xlane.f32.xlu0 %v1047_v43  ;;  %v869_v53 = vpop.xlane.xlu0 %868 }
 0x1e4   : > { %v946_v10 = vmul.f32 0.03125, %v866_v23  ;;  %v947_v32 = vmul.f32 0.03125, %v869_v53  ;;  %v1008_v16 = vmul.f32 %v3278_v15, %v3278_v15  ;;  %v1009_v62 = vmul.f32 %v3281_v47, %v3281_v47 }
 0x1e6   : > { %v3290_v41 = vsub.f32 %v3058_v13, %v946_v10  ;;  %v3293_v24 = vsub.f32 %v3061_v48, %v947_v32  ;;  %v1050_v54 = vsel %vm317_vm0, %v1008_v16, 0.0  ;;  %v1053_v2 = vsel %vm317_vm0, %v1009_v62, 0.0 }
 0x1e7   : > { %1051 = vadd.xlane.f32.xlu1 %v1050_v54  ;;  %v872_v35 = vpop.xlane.xlu1 %871  ;;  %1054 = vadd.xlane.f32.xlu0 %v1053_v2  ;;  %v875_v1 = vpop.xlane.xlu0 %874 }
 0x1e8   : > { %v948_v46 = vmul.f32 0.03125, %v872_v35  ;;  %v949_v44 = vmul.f32 0.03125, %v875_v1  ;;  %v1010_v7 = vmul.f32 %v3290_v41, %v3290_v41  ;;  %v1011_v0 = vmul.f32 %v3293_v24, %v3293_v24 }
 0x1ea   : > { %v3302_v36 = vsub.f32 %v3075_v55, %v948_v46  ;;  %v3305_v25 = vsub.f32 %v3078_v34, %v949_v44  ;;  %v1056_v45 = vsel %vm317_vm0, %v1010_v7, 0.0  ;;  %v1059_v20 = vsel %vm317_vm0, %v1011_v0, 0.0 }
 0x1eb   : > { %1057 = vadd.xlane.f32.xlu1 %v1056_v45  ;;  %v878_v22 = vpop.xlane.xlu1 %877  ;;  %1060 = vadd.xlane.f32.xlu0 %v1059_v20  ;;  %v881_v26 = vpop.xlane.xlu0 %880 }
 0x1ec   : > { %v950_v18 = vmul.f32 0.03125, %v878_v22  ;;  %v951_v61 = vmul.f32 0.03125, %v881_v26  ;;  %v1012_v43 = vmul.f32 %v3302_v36, %v3302_v36  ;;  %v1013_v23 = vmul.f32 %v3305_v25, %v3305_v25 }
 0x1ee   : > { %v3314_v53 = vsub.f32 %v3090_v21, %v950_v18  ;;  %v3317_v10 = vsub.f32 %v3093_v49, %v951_v61  ;;  %v1062_v32 = vsel %vm317_vm0, %v1012_v43, 0.0  ;;  %v1065_v16 = vsel %vm317_vm0, %v1013_v23, 0.0 }
 0x1ef   : > { %1063 = vadd.xlane.f32.xlu1 %v1062_v32  ;;  %v884_v62 = vpop.xlane.xlu1 %883  ;;  %1066 = vadd.xlane.f32.xlu0 %v1065_v16  ;;  %v887_v54 = vpop.xlane.xlu0 %886 }
 0x1f0   : > { %v952_v2 = vmul.f32 0.03125, %v884_v62  ;;  %v953_v35 = vmul.f32 0.03125, %v887_v54  ;;  %v1014_v1 = vmul.f32 %v3314_v53, %v3314_v53  ;;  %v1015_v46 = vmul.f32 %v3317_v10, %v3317_v10 }
 0x1f2   : > { %v3326_v44 = vsub.f32 %v3107_v51, %v952_v2  ;;  %v3329_v7 = vsub.f32 %v3110_v17, %v953_v35  ;;  %v1068_v0 = vsel %vm317_vm0, %v1014_v1, 0.0  ;;  %v1071_v45 = vsel %vm317_vm0, %v1015_v46, 0.0 }
 0x1f3   : > { %1069 = vadd.xlane.f32.xlu1 %v1068_v0  ;;  %v890_v20 = vpop.xlane.xlu1 %889  ;;  %1072 = vadd.xlane.f32.xlu0 %v1071_v45  ;;  %v893_v22 = vpop.xlane.xlu0 %892 }
 0x1f4   : > { %v954_v26 = vmul.f32 0.03125, %v890_v20  ;;  %v955_v18 = vmul.f32 0.03125, %v893_v22  ;;  %v1016_v61 = vmul.f32 %v3326_v44, %v3326_v44  ;;  %v1017_v43 = vmul.f32 %v3329_v7, %v3329_v7 }
 0x1f6   : > { %v3338_v23 = vsub.f32 %v3122_v29, %v954_v26  ;;  %v3341_v32 = vsub.f32 %v3125_v31, %v955_v18  ;;  %v1074_v16 = vsel %vm317_vm0, %v1016_v61, 0.0  ;;  %v1077_v62 = vsel %vm317_vm0, %v1017_v43, 0.0  ;;  %v2354_v18 = vld [vmem:[%s3879_s3 + $0x8] sm:$0xff]  }
 0x1f7   : > { %1075 = vadd.xlane.f32.xlu1 %v1074_v16  ;;  %v896_v54 = vpop.xlane.xlu1 %895  ;;  %1078 = vadd.xlane.f32.xlu0 %v1077_v62  ;;  %v899_v2 = vpop.xlane.xlu0 %898 }
 0x1f8   : > { %v956_v35 = vmul.f32 0.03125, %v896_v54  ;;  %v957_v1 = vmul.f32 0.03125, %v899_v2  ;;  %v1018_v46 = vmul.f32 %v3338_v23, %v3338_v23  ;;  %v1019_v0 = vmul.f32 %v3341_v32, %v3341_v32  ;;  %2246 = vmatprep.subr.bf16.mxu0 %v2354_v18 }
 0x1f9   : > { %2247 = vmatpush3.bf16.msra.mxu0 %v2354_v18 }
 0x1fa   : > { %v3350_v45 = vsub.f32 %v3139_v6, %v956_v35  ;;  %v3353_v20 = vsub.f32 %v3142_v12, %v957_v1  ;;  %v1080_v22 = vsel %vm317_vm0, %v1018_v46, 0.0  ;;  %v1083_v26 = vsel %vm317_vm0, %v1019_v0, 0.0 }
 0x1fb   : > { %1081 = vadd.xlane.f32.xlu1 %v1080_v22  ;;  %v902_v61 = vpop.xlane.xlu1 %901  ;;  %1084 = vadd.xlane.f32.xlu0 %v1083_v26  ;;  %v905_v43 = vpop.xlane.xlu0 %904  ;;  %v2355_v22 = vld [vmem:[%s3879_s3] sm:$0xff]  }
 0x1fc   : > { %v958_v16 = vmul.f32 0.03125, %v902_v61  ;;  %v959_v62 = vmul.f32 0.03125, %v905_v43  ;;  %v1020_v54 = vmul.f32 %v3350_v45, %v3350_v45  ;;  %v1021_v2 = vmul.f32 %v3353_v20, %v3353_v20  ;;  %2248 = vmatprep.subr.bf16.mxu0 %v2355_v22 }
 0x1fd   : > { %2249 = vmatpush3.bf16.msra.mxu0 %v2355_v22 }
 0x1fe   : > { %v3365_v35 = vsub.f32 %v3154_v38, %v958_v16  ;;  %v3368_v1 = vsub.f32 %v3158_v42, %v959_v62  ;;  %v1086_v46 = vsel %vm317_vm0, %v1020_v54, 0.0  ;;  %v1089_v0 = vsel %vm317_vm0, %v1021_v2, 0.0 }
 0x1ff   : > { %1087 = vadd.xlane.f32.xlu1 %v1086_v46  ;;  %v908_v26 = vpop.xlane.xlu1 %907  ;;  %1090 = vadd.xlane.f32.xlu0 %v1089_v0  ;;  %v911_v61 = vpop.xlane.xlu0 %910 }
 0x200   : > { %v960_v43 = vmul.f32 0.03125, %v908_v26  ;;  %v961_v18 = vmul.f32 0.03125, %v911_v61  ;;  %v1022_v16 = vmul.f32 %v3365_v35, %v3365_v35  ;;  %v1023_v62 = vmul.f32 %v3368_v1, %v3368_v1 }
 0x202   : > { %v3380_v54 = vsub.f32 %v3170_v50, %v960_v43  ;;  %v3383_v2 = vsub.f32 %v3174_v37, %v961_v18  ;;  %v1092_v46 = vsel %vm317_vm0, %v1022_v16, 0.0  ;;  %v1095_v0 = vsel %vm317_vm0, %v1023_v62, 0.0 }
 0x203   : > { %1093 = vadd.xlane.f32.xlu1 %v1092_v46  ;;  %v914_v26 = vpop.xlane.xlu1 %913  ;;  %1096 = vadd.xlane.f32.xlu0 %v1095_v0  ;;  %v917_v61 = vpop.xlane.xlu0 %916 }
 0x204   : > { %v962_v42 = vmul.f32 0.03125, %v914_v26  ;;  %v963_v6 = vmul.f32 0.03125, %v917_v61  ;;  %v1024_v38 = vmul.f32 %v3380_v54, %v3380_v54  ;;  %v1025_v22 = vmul.f32 %v3383_v2, %v3383_v2 }
 0x206   : > { %v3392_v43 = vsub.f32 %v3186_v30, %v962_v42  ;;  %v3395_v18 = vsub.f32 %v3190_v28, %v963_v6  ;;  %v1098_v16 = vsel %vm317_vm0, %v1024_v38, 0.0  ;;  %v1101_v62 = vsel %vm317_vm0, %v1025_v22, 0.0 }
 0x207   : > { %1099 = vadd.xlane.f32.xlu1 %v1098_v16  ;;  %v920_v46 = vpop.xlane.xlu1 %919  ;;  %1102 = vadd.xlane.f32.xlu0 %v1101_v62  ;;  %v923_v0 = vpop.xlane.xlu0 %922 }
 0x208   : > { %v964_v26 = vmul.f32 0.03125, %v920_v46  ;;  %v965_v61 = vmul.f32 0.03125, %v923_v0  ;;  %v1026_v50 = vmul.f32 %v3392_v43, %v3392_v43  ;;  %v1027_v42 = vmul.f32 %v3395_v18, %v3395_v18 }
 0x20a   : > { %v3404_v30 = vsub.f32 %v3202_v3, %v964_v26  ;;  %v3407_v6 = vsub.f32 %v3206_v40, %v965_v61  ;;  %v1104_v38 = vsel %vm317_vm0, %v1026_v50, 0.0  ;;  %v1107_v22 = vsel %vm317_vm0, %v1027_v42, 0.0 }
 0x20b   : > { %1105 = vadd.xlane.f32.xlu1 %v1104_v38  ;;  %v926_v16 = vpop.xlane.xlu1 %925  ;;  %1108 = vadd.xlane.f32.xlu0 %v1107_v22  ;;  %v929_v62 = vpop.xlane.xlu0 %928 }
 0x20c   : > { %v966_v46 = vmul.f32 0.03125, %v926_v16  ;;  %v967_v0 = vmul.f32 0.03125, %v929_v62  ;;  %v1028_v28 = vmul.f32 %v3404_v30, %v3404_v30  ;;  %v1029_v26 = vmul.f32 %v3407_v6, %v3407_v6 }
 0x20e   : > { %v3416_v3 = vsub.f32 %v3218_v56, %v966_v46  ;;  %v3419_v61 = vsub.f32 %v3222_v14, %v967_v0  ;;  %v1110_v50 = vsel %vm317_vm0, %v1028_v28, 0.0  ;;  %v1113_v42 = vsel %vm317_vm0, %v1029_v26, 0.0 }
 0x20f   : > { %1111 = vadd.xlane.f32.xlu1 %v1110_v50  ;;  %v932_v38 = vpop.xlane.xlu1 %931  ;;  %1114 = vadd.xlane.f32.xlu0 %v1113_v42  ;;  %v935_v22 = vpop.xlane.xlu0 %934 }
 0x210   : > { %v968_v16 = vmul.f32 0.03125, %v932_v38  ;;  %v969_v62 = vmul.f32 0.03125, %v935_v22  ;;  %v1030_v40 = vmul.f32 %v3416_v3, %v3416_v3  ;;  %v1031_v46 = vmul.f32 %v3419_v61, %v3419_v61 }
 0x212   : > { %v3428_v56 = vsub.f32 %v3233_v58, %v968_v16  ;;  %v3431_v0 = vsub.f32 %v3237_v11, %v969_v62  ;;  %v1116_v28 = vsel %vm317_vm0, %v1030_v40, 0.0  ;;  %v1119_v26 = vsel %vm317_vm0, %v1031_v46, 0.0 }
 0x213   : > { %1117 = vadd.xlane.f32.xlu1 %v1116_v28  ;;  %v938_v50 = vpop.xlane.xlu1 %937  ;;  %1120 = vadd.xlane.f32.xlu0 %v1119_v26 }
 0x214   : > { %v970_v42 = vmul.f32 0.03125, %v938_v50  ;;  %v1032_v38 = vmul.f32 %v3428_v56, %v3428_v56  ;;  %v1033_v22 = vmul.f32 %v3431_v0, %v3431_v0 }
 0x216   : > { %v3440_v16 = vsub.f32 %v3245_v8, %v970_v42  ;;  %v1122_v62 = vsel %vm317_vm0, %v1032_v38, 0.0  ;;  %v1125_v58 = vsel %vm317_vm0, %v1033_v22, 0.0 }
 0x217   : > { %1123 = vadd.xlane.f32.xlu1 %v1122_v62  ;;  %1126 = vadd.xlane.f32.xlu0 %v1125_v58 }
 0x218   : > { %v1034_v40 = vmul.f32 %v3440_v16, %v3440_v16 }
 0x21a   : > { %v1128_v46 = vsel %vm317_vm0, %v1034_v40, 0.0 }
 0x21b   : > { %1129 = vadd.xlane.f32.xlu1 %v1128_v46 }
 0x263   : > { %v1037_v28 = vpop.xlane.xlu0 %1036 }
 0x264   : > { %v1131_v26 = vmul.f32 0.03125, %v1037_v28 }
 0x266   : > { %v1163_v50 = vadd.f32 1e-05, %v1131_v26 }
 0x268   : > { %v1040_v14 = vpop.xlane.xlu1 %1039  ;;  %v1043_v11 = vpop.xlane.xlu0 %1042  ;;  %2428 = vrsqrt.f32 %v1163_v50 }
 0x269   : > { %v1132_v37 = vmul.f32 0.03125, %v1040_v14  ;;  %v1133_v42 = vmul.f32 0.03125, %v1043_v11 }
 0x26b   : > { %v1164_v8 = vadd.f32 1e-05, %v1132_v37  ;;  %v1165_v38 = vadd.f32 1e-05, %v1133_v42 }
 0x26c   : > { %v1046_v31 = vpop.xlane.xlu1 %1045  ;;  %v1049_v22 = vpop.xlane.xlu0 %1048 }
 0x26d   : > { %2430 = vrsqrt.f32 %v1164_v8  ;;  %v1134_v58 = vmul.f32 0.03125, %v1046_v31  ;;  %v1135_v62 = vmul.f32 0.03125, %v1049_v22 }
 0x26e   : > { %2432 = vrsqrt.f32 %v1165_v38 }
 0x26f   : > { %v1166_v12 = vadd.f32 1e-05, %v1134_v58  ;;  %v1167_v51 = vadd.f32 1e-05, %v1135_v62 }
 0x270   : > { %v1052_v40 = vpop.xlane.xlu1 %1051  ;;  %v1055_v46 = vpop.xlane.xlu0 %1054 }
 0x271   : > { %2434 = vrsqrt.f32 %v1166_v12  ;;  %v1136_v28 = vmul.f32 0.03125, %v1052_v40  ;;  %v1137_v26 = vmul.f32 0.03125, %v1055_v46 }
 0x272   : > { %2436 = vrsqrt.f32 %v1167_v51 }
 0x273   : > { %v1168_v29 = vadd.f32 1e-05, %v1136_v28  ;;  %v1169_v14 = vadd.f32 1e-05, %v1137_v26 }
 0x274   : > { %v1058_v11 = vpop.xlane.xlu1 %1057  ;;  %v1061_v50 = vpop.xlane.xlu0 %1060 }
 0x275   : > { %2438 = vrsqrt.f32 %v1168_v29  ;;  %v1138_v37 = vmul.f32 0.03125, %v1058_v11  ;;  %v1139_v42 = vmul.f32 0.03125, %v1061_v50  ;;  %v2429_v49 = vpop.eup %2428 }
 0x276   : > { %2440 = vrsqrt.f32 %v1169_v14  ;;  %v1227_v40 = vmul.f32 %v2429_v49, %v3250_v19 }
 0x277   : > { %v1170_v31 = vadd.f32 1e-05, %v1138_v37  ;;  %v1171_v8 = vadd.f32 1e-05, %v1139_v42 }
 0x278   : > { %v1064_v38 = vpop.xlane.xlu1 %1063  ;;  %v1067_v22 = vpop.xlane.xlu0 %1066 }
 0x279   : > { %2442 = vrsqrt.f32 %v1170_v31  ;;  %v1140_v58 = vmul.f32 0.03125, %v1064_v38  ;;  %v1141_v62 = vmul.f32 0.03125, %v1067_v22 }
 0x27a   : > { %v2431_v12 = vpop.eup %2430  ;;  %2444 = vrsqrt.f32 %v1171_v8 }
 0x27b   : > { %v2433_v51 = vpop.eup %2432  ;;  %v1172_v46 = vadd.f32 1e-05, %v1140_v58  ;;  %v1173_v28 = vadd.f32 1e-05, %v1141_v62  ;;  %v1228_v29 = vmul.f32 %v2431_v12, %v3256_v60 }
 0x27c   : > { %v1070_v26 = vpop.xlane.xlu1 %1069  ;;  %v1073_v11 = vpop.xlane.xlu0 %1072  ;;  %v1229_v31 = vmul.f32 %v2433_v51, %v3259_v59 }
 0x27d   : > { %2446 = vrsqrt.f32 %v1172_v46  ;;  %v1142_v14 = vmul.f32 0.03125, %v1070_v26  ;;  %v1143_v50 = vmul.f32 0.03125, %v1073_v11  ;;  %v1259_v37 = vpack.c.bf16 %v1228_v29, %v1227_v40 }
 0x27e   : > { %v2435_v42 = vpop.eup %2434  ;;  %2448 = vrsqrt.f32 %v1173_v28 }
 0x27f   : > { %v2437_v38 = vpop.eup %2436  ;;  %v1174_v22 = vadd.f32 1e-05, %v1142_v14  ;;  %v1175_v17 = vadd.f32 1e-05, %v1143_v50  ;;  %2250 = vmatprep.mubr.msk.bf16.mxu0 %vm317_vm0, %v1259_v37  ;;  %v1230_v49 = vmul.f32 %v2435_v42, %v3266_v9 }
 0x280   : > { %v1076_v19 = vpop.xlane.xlu1 %1075  ;;  %v1079_v8 = vpop.xlane.xlu0 %1078  ;;  %v1231_v40 = vmul.f32 %v2437_v38, %v3269_v33 }
 0x281   : > { %2450 = vrsqrt.f32 %v1174_v22  ;;  %v1144_v60 = vmul.f32 0.03125, %v1076_v19  ;;  %v1145_v58 = vmul.f32 0.03125, %v1079_v8  ;;  %v1260_v62 = vpack.c.bf16 %v1230_v49, %v1229_v31 }
 0x282   : > { %v2439_v12 = vpop.eup %2438  ;;  %2452 = vrsqrt.f32 %v1175_v17 }
 0x283   : > { %v1176_v46 = vadd.f32 1e-05, %v1144_v60  ;;  %v1177_v59 = vadd.f32 1e-05, %v1145_v58  ;;  %2251 = vmatmul.mubr.msk.bf16.vlgmr.msra.gmra.mxu0 %vm317_vm0, %v1260_v62  ;;  %v1232_v51 = vmul.f32 %v2439_v12, %v3278_v15  ;;  %v2441_v28 = vpop.eup %2440 }
 0x284   : > { %v1082_v29 = vpop.xlane.xlu1 %1081  ;;  %v1085_v26 = vpop.xlane.xlu0 %1084  ;;  %v1233_v17 = vmul.f32 %v2441_v28, %v3281_v47 }
 0x285   : > { %2454 = vrsqrt.f32 %v1176_v46  ;;  %v1146_v9 = vmul.f32 0.03125, %v1082_v29  ;;  %v1147_v11 = vmul.f32 0.03125, %v1085_v26  ;;  %v1261_v14 = vpack.c.bf16 %v1232_v51, %v1231_v40 }
 0x286   : > { %v2443_v50 = vpop.eup %2442  ;;  %2456 = vrsqrt.f32 %v1177_v59 }
 0x287   : > { %v1178_v37 = vadd.f32 1e-05, %v1146_v9  ;;  %v1179_v42 = vadd.f32 1e-05, %v1147_v11  ;;  %2254 = vmatprep.mubr.msk.bf16.mxu0 %vm317_vm0, %v1261_v14  ;;  %v1234_v33 = vmul.f32 %v2443_v50, %v3290_v41  ;;  %v2445_v31 = vpop.eup %2444 }
 0x288   : > { %v1088_v38 = vpop.xlane.xlu1 %1087  ;;  %v1091_v15 = vpop.xlane.xlu0 %1090  ;;  %v1235_v62 = vmul.f32 %v2445_v31, %v3293_v24 }
 0x289   : > { %2458 = vrsqrt.f32 %v1178_v37  ;;  %v1148_v22 = vmul.f32 0.03125, %v1088_v38  ;;  %v1149_v49 = vmul.f32 0.03125, %v1091_v15  ;;  %v1262_v19 = vpack.c.bf16 %v1234_v33, %v1233_v17 }
 0x28a   : > { %v2447_v8 = vpop.eup %2446  ;;  %2460 = vrsqrt.f32 %v1179_v42 }
 0x28b   : > { %v1180_v60 = vadd.f32 1e-05, %v1148_v22  ;;  %v1181_v58 = vadd.f32 1e-05, %v1149_v49  ;;  %2255 = vmatmul.mubr.msk.bf16.gmra.mxu0 %vm317_vm0, %v1262_v19  ;;  %v1236_v12 = vmul.f32 %v2447_v8, %v3302_v36  ;;  %v2449_v47 = vpop.eup %2448 }
 0x28c   : > { %v1094_v40 = vpop.xlane.xlu1 %1093  ;;  %v1097_v41 = vpop.xlane.xlu0 %1096  ;;  %v1237_v9 = vmul.f32 %v2449_v47, %v3305_v25 }
 0x28d   : > { %2462 = vrsqrt.f32 %v1180_v60  ;;  %v1150_v46 = vmul.f32 0.03125, %v1094_v40  ;;  %v1151_v59 = vmul.f32 0.03125, %v1097_v41  ;;  %v1263_v51 = vpack.c.bf16 %v1236_v12, %v1235_v62 }
 0x28e   : > { %v2451_v28 = vpop.eup %2450  ;;  %2464 = vrsqrt.f32 %v1181_v58 }
 0x28f   : > { %v1182_v29 = vadd.f32 1e-05, %v1150_v46  ;;  %v1183_v26 = vadd.f32 1e-05, %v1151_v59  ;;  %2258 = vmatprep.mubr.msk.bf16.mxu0 %vm317_vm0, %v1263_v51  ;;  %v1238_v11 = vmul.f32 %v2451_v28, %v3314_v53  ;;  %v2453_v24 = vpop.eup %2452 }
 0x290   : > { %v1100_v14 = vpop.xlane.xlu1 %1099  ;;  %v1103_v36 = vpop.xlane.xlu0 %1102  ;;  %v1239_v15 = vmul.f32 %v2453_v24, %v3317_v10 }
 0x291   : > { %2466 = vrsqrt.f32 %v1182_v29  ;;  %v1152_v50 = vmul.f32 0.03125, %v1100_v14  ;;  %v1153_v37 = vmul.f32 0.03125, %v1103_v36  ;;  %v1264_v42 = vpack.c.bf16 %v1238_v11, %v1237_v9 }
 0x292   : > { %v2455_v17 = vpop.eup %2454  ;;  %2468 = vrsqrt.f32 %v1183_v26 }
 0x293   : > { %v2457_v33 = vpop.eup %2456  ;;  %v1184_v31 = vadd.f32 1e-05, %v1152_v50  ;;  %v1185_v38 = vadd.f32 1e-05, %v1153_v37  ;;  %2259 = vmatmul.mubr.msk.bf16.gmra.mxu0 %vm317_vm0, %v1264_v42  ;;  %v1240_v25 = vmul.f32 %v2455_v17, %v3326_v44 }
 0x294   : > { %v1106_v22 = vpop.xlane.xlu1 %1105  ;;  %v1109_v53 = vpop.xlane.xlu0 %1108  ;;  %v1241_v58 = vmul.f32 %v2457_v33, %v3329_v7 }
 0x295   : > { %2470 = vrsqrt.f32 %v1184_v31  ;;  %v1154_v49 = vmul.f32 0.03125, %v1106_v22  ;;  %v1155_v19 = vmul.f32 0.03125, %v1109_v53  ;;  %v1265_v8 = vpack.c.bf16 %v1240_v25, %v1239_v15 }
 0x296   : > { %v2459_v60 = vpop.eup %2458  ;;  %2472 = vrsqrt.f32 %v1185_v38 }
 0x297   : > { %v2461_v62 = vpop.eup %2460  ;;  %v1186_v12 = vadd.f32 1e-05, %v1154_v49  ;;  %v1187_v47 = vadd.f32 1e-05, %v1155_v19  ;;  %2262 = vmatprep.mubr.msk.bf16.mxu0 %vm317_vm0, %v1265_v8  ;;  %v1242_v40 = vmul.f32 %v2459_v60, %v3338_v23 }
 0x298   : > { %v1112_v10 = vpop.xlane.xlu1 %1111  ;;  %v1115_v41 = vpop.xlane.xlu0 %1114  ;;  %v1243_v28 = vmul.f32 %v2461_v62, %v3341_v32 }
 0x299   : > { %2474 = vrsqrt.f32 %v1186_v12  ;;  %v1156_v44 = vmul.f32 0.03125, %v1112_v10  ;;  %v1157_v46 = vmul.f32 0.03125, %v1115_v41  ;;  %v1266_v59 = vpack.c.bf16 %v1242_v40, %v1241_v58 }
 0x29a   : > { %v2463_v51 = vpop.eup %2462  ;;  %2476 = vrsqrt.f32 %v1187_v47 }
 0x29b   : > { %v2465_v29 = vpop.eup %2464  ;;  %v1188_v7 = vadd.f32 1e-05, %v1156_v44  ;;  %v1189_v26 = vadd.f32 1e-05, %v1157_v46  ;;  %2263 = vmatmul.mubr.msk.bf16.gmra.mxu0 %vm317_vm0, %v1266_v59  ;;  %v1244_v9 = vmul.f32 %v2463_v51, %v3350_v45 }
 0x29c   : > { %v1118_v11 = vpop.xlane.xlu1 %1117  ;;  %v1121_v24 = vpop.xlane.xlu0 %1120  ;;  %v1245_v37 = vmul.f32 %v2465_v29, %v3353_v20 }
 0x29d   : > { %2478 = vrsqrt.f32 %v1188_v7  ;;  %v1158_v23 = vmul.f32 0.03125, %v1118_v11  ;;  %v1159_v14 = vmul.f32 0.03125, %v1121_v24  ;;  %v1267_v36 = vpack.c.bf16 %v1244_v9, %v1243_v28 }
 0x29e   : > { %v2467_v50 = vpop.eup %2466  ;;  %2480 = vrsqrt.f32 %v1189_v26 }
 0x29f   : > { %v2469_v42 = vpop.eup %2468  ;;  %v1190_v32 = vadd.f32 1e-05, %v1158_v23  ;;  %v1191_v17 = vadd.f32 1e-05, %v1159_v14  ;;  %2266 = vmatprep.mubr.msk.bf16.mxu0 %vm317_vm0, %v1267_v36  ;;  %v1246_v33 = vmul.f32 %v2467_v50, %v3365_v35  ;;  %v2361_v14 = vld [vmem:[%s3881_s5 + $0x10] sm:$0xff]   ;;  %v2362_v36 = vld [vmem:[%s3881_s5 + $0x8] sm:$0xff]  }
 0x2a0   : > { %v1124_v31 = vpop.xlane.xlu1 %1123  ;;  %v1127_v38 = vpop.xlane.xlu0 %1126  ;;  %v1247_v53 = vmul.f32 %v2469_v42, %v3368_v1  ;;  %v2363_v50 = vld [vmem:[%s3881_s5] sm:$0xff]  }
 0x2a1   : > { %2482 = vrsqrt.f32 %v1190_v32  ;;  %v1160_v45 = vmul.f32 0.03125, %v1124_v31  ;;  %v1161_v15 = vmul.f32 0.03125, %v1127_v38  ;;  %v1268_v25 = vpack.c.bf16 %v1246_v33, %v1245_v37  ;;  %v3522_v37 = vld [vmem:[%s3880_s4] ss:$0 sm:$0xff] }
 0x2a2   : > { %v2471_v22 = vpop.eup %2470  ;;  %2484 = vrsqrt.f32 %v1191_v17 }
 0x2a3   : > { %v1192_v49 = vadd.f32 1e-05, %v1160_v45  ;;  %v1193_v20 = vadd.f32 1e-05, %v1161_v15  ;;  %2267 = vmatmul.mubr.msk.bf16.gmra.mxu0 %vm317_vm0, %v1268_v25  ;;  %v1248_v19 = vmul.f32 %v2471_v22, %v3380_v54  ;;  %v2473_v8 = vpop.eup %2472 }
 0x2a4   : > { %v1130_v60 = vpop.xlane.xlu1 %1129  ;;  %v1249_v47 = vmul.f32 %v2473_v8, %v3383_v2 }
 0x2a5   : > { %2486 = vrsqrt.f32 %v1192_v49  ;;  %v1162_v35 = vmul.f32 0.03125, %v1130_v60  ;;  %v1269_v58 = vpack.c.bf16 %v1248_v19, %v1247_v53 }
 0x2a6   : > { %v2475_v62 = vpop.eup %2474  ;;  %2488 = vrsqrt.f32 %v1193_v20 }
 0x2a7   : > { %v1194_v12 = vadd.f32 1e-05, %v1162_v35  ;;  %2270 = vmatprep.mubr.msk.bf16.mxu0 %vm317_vm0, %v1269_v58  ;;  %v1250_v1 = vmul.f32 %v2475_v62, %v3392_v43  ;;  %v2477_v40 = vpop.eup %2476 }
 0x2a8   : > { %v1251_v54 = vmul.f32 %v2477_v40, %v3395_v18 }
 0x2a9   : > { %2490 = vrsqrt.f32 %v1194_v12  ;;  %v1270_v10 = vpack.c.bf16 %v1250_v1, %v1249_v47 }
 0x2aa   : > { %v2479_v41 = vpop.eup %2478 }
 0x2ab   : > { %2271 = vmatmul.mubr.msk.bf16.gmra.mxu0 %vm317_vm0, %v1270_v10  ;;  %v1252_v44 = vmul.f32 %v2479_v41, %v3404_v30  ;;  %v2481_v46 = vpop.eup %2480 }
 0x2ac   : > { %v1253_v28 = vmul.f32 %v2481_v46, %v3407_v6 }
 0x2ad   : > { %v1271_v59 = vpack.c.bf16 %v1252_v44, %v1251_v54 }
 0x2ae   : > { %v2483_v51 = vpop.eup %2482 }
 0x2af   : > { %2274 = vmatprep.mubr.msk.bf16.mxu0 %vm317_vm0, %v1271_v59  ;;  %v1254_v2 = vmul.f32 %v2483_v51, %v3416_v3  ;;  %v2485_v43 = vpop.eup %2484  ;;  %v2356_v3 = vld [vmem:[%s3881_s5 + $0x38] sm:$0xff]  }
 0x2b0   : > { %v1255_v26 = vmul.f32 %v2485_v43, %v3419_v61  ;;  %2282 = vmatprep.subr.bf16.mxu0 %v2356_v3  ;;  %2330 = vmatprep.subr.bf16.mxu1 %v2356_v3  ;;  %v2358_v61 = vld [vmem:[%s3881_s5 + $0x28] sm:$0xff]  }
 0x2b1   : > { %v1272_v29 = vpack.c.bf16 %v1254_v2, %v1253_v28  ;;  %2283 = vmatpush3.bf16.msra.mxu0 %v2356_v3  ;;  %2338 = vmatpush3.bf16.msra.mxu1 %v2356_v3 }
 0x2b2   : > { %v2487_v7 = vpop.eup %2486 }
 0x2b3   : > { %2275 = vmatmul.mubr.msk.bf16.gmra.mxu0 %vm317_vm0, %v1272_v29  ;;  %v1256_v18 = vmul.f32 %v2487_v7, %v3428_v56  ;;  %v2489_v9 = vpop.eup %2488  ;;  %v2357_v56 = vld [vmem:[%s3881_s5 + $0x30] sm:$0xff]  }
 0x2b4   : > { %v1257_v24 = vmul.f32 %v2489_v9, %v3431_v0  ;;  %2284 = vmatprep.subr.bf16.mxu0 %v2357_v56  ;;  %2331 = vmatprep.subr.bf16.mxu1 %v2357_v56  ;;  %v2359_v0 = vld [vmem:[%s3881_s5 + $0x20] sm:$0xff]  }
 0x2b5   : > { %v1273_v30 = vpack.c.bf16 %v1256_v18, %v1255_v26  ;;  %2285 = vmatpush3.bf16.msra.mxu0 %v2357_v56  ;;  %2339 = vmatpush3.bf16.msra.mxu1 %v2357_v56 }
 0x2b6   : > { %v2491_v11 = vpop.eup %2490  ;;  %2286 = vmatprep.subr.bf16.mxu0 %v2358_v61  ;;  %2332 = vmatprep.subr.bf16.mxu1 %v2358_v61 }
 0x2b7   : > { %2278 = vmatprep.mubr.msk.bf16.mxu0 %vm317_vm0, %v1273_v30  ;;  %v1258_v6 = vmul.f32 %v2491_v11, %v3440_v16  ;;  %v2360_v16 = vld [vmem:[%s3881_s5 + $0x18] sm:$0xff]  }
 0x2b9   : > { %v1274_v23 = vpack.c.bf16 %v1258_v6, %v1257_v24  ;;  %2287 = vmatpush3.bf16.msra.mxu0 %v2358_v61  ;;  %2340 = vmatpush3.bf16.msra.mxu1 %v2358_v61 }
 0x2ba   : > { %2288 = vmatprep.subr.bf16.mxu0 %v2359_v0  ;;  %2333 = vmatprep.subr.bf16.mxu1 %v2359_v0 }
 0x2bb   : > { %2279 = vmatmul.mubr.msk.bf16.gmra.mxu0 %vm317_vm0, %v1274_v23 }
 0x2bd   : > { %2289 = vmatpush3.bf16.msra.mxu0 %v2359_v0  ;;  %2341 = vmatpush3.bf16.msra.mxu1 %v2359_v0 }
 0x2be   : > { %2290 = vmatprep.subr.bf16.mxu0 %v2360_v16  ;;  %2334 = vmatprep.subr.bf16.mxu1 %v2360_v16 }
 0x2c1   : > { %2291 = vmatpush3.bf16.msra.mxu0 %v2360_v16  ;;  %2342 = vmatpush3.bf16.msra.mxu1 %v2360_v16 }
 0x2c2   : > { %2292 = vmatprep.subr.bf16.mxu0 %v2361_v14  ;;  %2335 = vmatprep.subr.bf16.mxu1 %v2361_v14 }
 0x2c5   : > { %2293 = vmatpush3.bf16.msra.mxu0 %v2361_v14  ;;  %2343 = vmatpush3.bf16.msra.mxu1 %v2361_v14 }
 0x2c6   : > { %2294 = vmatprep.subr.bf16.mxu0 %v2362_v36  ;;  %2336 = vmatprep.subr.bf16.mxu1 %v2362_v36 }
 0x2c9   : > { %2295 = vmatpush3.bf16.msra.mxu0 %v2362_v36  ;;  %2344 = vmatpush3.bf16.msra.mxu1 %v2362_v36 }
 0x2ca   : > { %2296 = vmatprep.subr.bf16.mxu0 %v2363_v50  ;;  %2337 = vmatprep.subr.bf16.mxu1 %v2363_v50 }
 0x2cd   : > { %2297 = vmatpush3.bf16.msra.mxu0 %v2363_v50  ;;  %2345 = vmatpush3.bf16.msra.mxu1 %v2363_v50 }
 0x343   : > { %v2252_v42 = vpop.f32.mrf.mxu0 }
 0x344   : > { %v1389_v32 = vadd.f32 %v2252_v42, %v3522_v37 }
 0x345   : > { %v1380_v17 = vpop.f32.mrf.mxu0 }
 0x346   : > { %v1509_v33 = vmul.f32 %v1389_v32, %v1389_v32  ;;  %v1381_v31 = vadd.f32 %v3522_v37, %v1380_v17  ;;  %v3538_v42 = vmul.f32 0.5, %v1389_v32 }
 0x347   : > { %v2253_v38 = vpop.f32.mrf.mxu0 }
 0x348   : > { %v1541_v45 = vmul.f32 0.044715, %v1509_v33  ;;  %v1507_v15 = vmul.f32 %v1381_v31, %v1381_v31  ;;  %v1392_v25 = vadd.f32 %v2253_v38, %v3522_v37  ;;  %v3540_v17 = vmul.f32 0.5, %v1381_v31 }
 0x349   : > { %v1383_v22 = vpop.f32.mrf.mxu0 }
 0x34a   : > { %v1573_v53 = vadd.f32 1.0, %v1541_v45  ;;  %v1510_v49 = vmul.f32 %v1392_v25, %v1392_v25  ;;  %v1384_v20 = vadd.f32 %v3522_v37, %v1383_v22  ;;  %v1539_v8 = vmul.f32 0.044715, %v1507_v15 }
 0x34b   : > { %v2256_v19 = vpop.f32.mrf.mxu0  ;;  %v3545_v45 = vmul.f32 0.5, %v1392_v25 }
 0x34c   : > { %v1542_v60 = vmul.f32 0.044715, %v1510_v49  ;;  %v1405_v35 = vadd.f32 %v2256_v19, %v3522_v37  ;;  %v1605_v58 = vmul.f32 %v1573_v53, %v1389_v32  ;;  %v1508_v62 = vmul.f32 %v1384_v20, %v1384_v20 }
 0x34d   : > { %v1396_v12 = vpop.f32.mrf.mxu0  ;;  %v1571_v54 = vadd.f32 1.0, %v1539_v8  ;;  %v3547_v49 = vmul.f32 0.5, %v1384_v20 }
 0x34e   : > { %v1574_v47 = vadd.f32 1.0, %v1542_v60  ;;  %v1513_v1 = vmul.f32 %v1405_v35, %v1405_v35  ;;  %v1540_v40 = vmul.f32 0.044715, %v1508_v62  ;;  %v1397_v10 = vadd.f32 %v3522_v37, %v1396_v12 }
 0x34f   : > { %v2257_v41 = vpop.f32.mrf.mxu0  ;;  %v1669_v46 = vmul.f32 0.7978846, %v1605_v58  ;;  %v1603_v24 = vmul.f32 %v1571_v54, %v1381_v31 }
 0x350   : > { %v1606_v44 = vmul.f32 %v1574_v47, %v1392_v25  ;;  %v1545_v59 = vmul.f32 0.044715, %v1513_v1  ;;  %v1511_v51 = vmul.f32 %v1397_v10, %v1397_v10  ;;  %v1408_v28 = vadd.f32 %v2257_v41, %v3522_v37 }
 0x351   : > { %v1399_v2 = vpop.f32.mrf.mxu0  ;;  %v1572_v43 = vadd.f32 1.0, %v1540_v40  ;;  %2492 = vtanh.f32 %v1669_v46  ;;  %v1667_v38 = vmul.f32 0.7978846, %v1603_v24  ;;  %v3552_v47 = vmul.f32 0.5, %v1405_v35 }
 0x352   : > { %v1400_v29 = vadd.f32 %v3522_v37, %v1399_v2  ;;  %v1543_v7 = vmul.f32 0.044715, %v1511_v51  ;;  %v1514_v26 = vmul.f32 %v1408_v28, %v1408_v28  ;;  %v1670_v9 = vmul.f32 0.7978846, %v1606_v44 }
 0x353   : > { %v2260_v18 = vpop.f32.mrf.mxu0  ;;  %v1577_v6 = vadd.f32 1.0, %v1545_v59  ;;  %v1604_v56 = vmul.f32 %v1572_v43, %v1384_v20  ;;  %v3555_v40 = vmul.f32 0.5, %v1397_v10  ;;  %v3557_v41 = vmul.f32 0.5, %v1408_v28 }
 0x354   : > { %v1512_v30 = vmul.f32 %v1400_v29, %v1400_v29  ;;  %v3533_v11 = vadd.f32 %v2260_v18, %v3522_v37  ;;  %v1546_v23 = vmul.f32 0.044715, %v1514_v26  ;;  %v1575_v61 = vadd.f32 1.0, %v1543_v7 }
 0x355   : > { %v1412_v3 = vpop.f32.mrf.mxu0  ;;  %2494 = vtanh.f32 %v1670_v9  ;;  %v1609_v15 = vmul.f32 %v1577_v6, %v1405_v35  ;;  %v1668_v19 = vmul.f32 0.7978846, %v1604_v56  ;;  %v3559_v51 = vmul.f32 0.5, %v1400_v29 }
 0x356   : > { %v1544_v0 = vmul.f32 0.044715, %v1512_v30  ;;  %v1578_v16 = vadd.f32 1.0, %v1546_v23  ;;  %v1517_v14 = vmul.f32 %v3533_v11, %v3533_v11  ;;  %v1413_v36 = vadd.f32 %v3522_v37, %v1412_v3 }
 0x357   : > { %v2261_v50 = vpop.f32.mrf.mxu0  ;;  %v1607_v8 = vmul.f32 %v1575_v61, %v1397_v10  ;;  %2496 = vtanh.f32 %v1667_v38  ;;  %v1673_v20 = vmul.f32 0.7978846, %v1609_v15  ;;  %v3562_v18 = vmul.f32 0.5, %v3533_v11 }
 0x358   : > { %v3543_v33 = vadd.f32 %v2261_v50, %v3522_v37  ;;  %v1515_v22 = vmul.f32 %v1413_v36, %v1413_v36  ;;  %v1576_v60 = vadd.f32 1.0, %v1544_v0  ;;  %v1610_v58 = vmul.f32 %v1578_v16, %v1408_v28 }
 0x359   : > { %v1415_v53 = vpop.f32.mrf.mxu0  ;;  %v1549_v32 = vmul.f32 0.044715, %v1517_v14  ;;  %2498 = vtanh.f32 %v1668_v19  ;;  %v1671_v46 = vmul.f32 0.7978846, %v1607_v8  ;;  %v3567_v30 = vmul.f32 0.5, %v1413_v36 }
 0x35a   : > { %v1518_v31 = vmul.f32 %v3543_v33, %v3543_v33  ;;  %v1416_v62 = vadd.f32 %v3522_v37, %v1415_v53  ;;  %v1547_v25 = vmul.f32 0.044715, %v1515_v22  ;;  %v1608_v59 = vmul.f32 %v1576_v60, %v1400_v29 }
 0x35b   : > { %v2264_v12 = vpop.f32.mrf.mxu0  ;;  %v1674_v2 = vmul.f32 0.7978846, %v1610_v58  ;;  %v1581_v43 = vadd.f32 1.0, %v1549_v32  ;;  %2500 = vtanh.f32 %v1673_v20  ;;  %v3573_v56 = vmul.f32 0.5, %v3543_v33 }
 0x35c   : > { %v1437_v1 = vadd.f32 %v2264_v12, %v3522_v37  ;;  %v1516_v54 = vmul.f32 %v1416_v62, %v1416_v62  ;;  %v1550_v35 = vmul.f32 0.044715, %v1518_v31  ;;  %v1579_v10 = vadd.f32 1.0, %v1547_v25 }
 0x35d   : > { %v1428_v44 = vpop.f32.mrf.mxu0  ;;  %2502 = vtanh.f32 %v1671_v46  ;;  %v1672_v3 = vmul.f32 0.7978846, %v1608_v59  ;;  %v1613_v0 = vmul.f32 %v1581_v43, %v3533_v11  ;;  %v3580_v22 = vmul.f32 0.5, %v1416_v62 }
 0x35e   : > { %v1521_v7 = vmul.f32 %v1437_v1, %v1437_v1  ;;  %v1548_v9 = vmul.f32 0.044715, %v1516_v54  ;;  %v3565_v28 = vadd.f32 %v3522_v37, %v1428_v44  ;;  %v2493_v23 = vpop.eup %2492  ;;  %2504 = vtanh.f32 %v1674_v2 }
 0x35f   : > { %v2265_v26 = vpop.f32.mrf.mxu0  ;;  %v1582_v16 = vadd.f32 1.0, %v1550_v35  ;;  %v1611_v38 = vmul.f32 %v1579_v10, %v1413_v36  ;;  %v1733_v8 = vadd.f32 1.0, %v2493_v23  ;;  %2506 = vtanh.f32 %v1672_v3 }
 0x360   : > { %v1553_v24 = vmul.f32 0.044715, %v1521_v7  ;;  %v3570_v29 = vadd.f32 %v2265_v26, %v3522_v37  ;;  %v1519_v61 = vmul.f32 %v3565_v28, %v3565_v28  ;;  %v1580_v15 = vadd.f32 1.0, %v1548_v9 }
 0x361   : > { %v1431_v6 = vpop.f32.mrf.mxu0  ;;  %v1677_v36 = vmul.f32 0.7978846, %v1613_v0  ;;  %v1614_v20 = vmul.f32 %v1582_v16, %v3543_v33  ;;  %v3592_v54 = vmul.f32 0.5, %v1437_v1  ;;  %v1675_v2 = vmul.f32 0.7978846, %v1611_v38 }
 0x362   : > { %v1522_v14 = vmul.f32 %v3570_v29, %v3570_v29  ;;  %v1551_v53 = vmul.f32 0.044715, %v1519_v61  ;;  %v2495_v19 = vpop.eup %2494  ;;  %v1585_v60 = vadd.f32 1.0, %v1553_v24  ;;  %v3583_v32 = vadd.f32 %v3522_v37, %v1431_v6 }
 0x363   : > { %v2268_v50 = vpop.f32.mrf.mxu0  ;;  %v1734_v59 = vadd.f32 1.0, %v2495_v19  ;;  %v1612_v43 = vmul.f32 %v1580_v15, %v1416_v62  ;;  %v1765_v6 = vmul.f32 %v1733_v8, %v3538_v42  ;;  %v1678_v0 = vmul.f32 0.7978846, %v1614_v20 }
 0x364   : > { %v1554_v58 = vmul.f32 0.044715, %v1522_v14  ;;  %v1583_v11 = vadd.f32 1.0, %v1551_v53  ;;  %v3586_v12 = vadd.f32 %v2268_v50, %v3522_v37  ;;  %v1520_v44 = vmul.f32 %v3583_v32, %v3583_v32  ;;  %v2497_v33 = vpop.eup %2496 }
 0x365   : > { %v1444_v31 = vpop.f32.mrf.mxu0  ;;  %v1617_v7 = vmul.f32 %v1585_v60, %v1437_v1  ;;  %v1766_v38 = vmul.f32 %v1734_v59, %v3545_v45  ;;  %2508 = vtanh.f32 %v1677_v36  ;;  %v1676_v15 = vmul.f32 0.7978846, %v1612_v43 }
 0x366   : > { %v3589_v25 = vadd.f32 %v3522_v37, %v1444_v31  ;;  %v1525_v35 = vmul.f32 %v3586_v12, %v3586_v12  ;;  %v1586_v26 = vadd.f32 1.0, %v1554_v58  ;;  %v1552_v10 = vmul.f32 0.044715, %v1520_v44  ;;  %v2499_v62 = vpop.eup %2498 }
 0x367   : > { %v2269_v46 = vpop.f32.mrf.mxu0  ;;  %v1615_v23 = vmul.f32 %v1583_v11, %v3565_v28  ;;  %2510 = vtanh.f32 %v1675_v2  ;;  %v1681_v53 = vmul.f32 0.7978846, %v1617_v7  ;;  %v1731_v44 = vadd.f32 1.0, %v2497_v33 }
 0x368   : > { %v1523_v9 = vmul.f32 %v3589_v25, %v3589_v25  ;;  %v1557_v3 = vmul.f32 0.044715, %v1525_v35  ;;  %v3603_v61 = vadd.f32 %v2269_v46, %v3522_v37  ;;  %v1584_v16 = vadd.f32 1.0, %v1552_v10  ;;  %v2501_v58 = vpop.eup %2500 }
 0x369   : > { %v1447_v24 = vpop.f32.mrf.mxu0  ;;  %v1618_v19 = vmul.f32 %v1586_v26, %v3570_v29  ;;  %v1679_v31 = vmul.f32 0.7978846, %v1615_v23  ;;  %2512 = vtanh.f32 %v1678_v0  ;;  %v1732_v59 = vadd.f32 1.0, %v2499_v62 }
 0x36a   : > { %v1555_v14 = vmul.f32 0.044715, %v1523_v9  ;;  %v3606_v1 = vadd.f32 %v3522_v37, %v1447_v24  ;;  %v1526_v42 = vmul.f32 %v3603_v61, %v3603_v61  ;;  %v1616_v11 = vmul.f32 %v1584_v16, %v3583_v32  ;;  %v2503_v45 = vpop.eup %2502 }
 0x36b   : > { %v2272_v50 = vpop.f32.mrf.mxu0  ;;  %v1589_v20 = vadd.f32 1.0, %v1557_v3  ;;  %v2505_v2 = vpop.eup %2504  ;;  %v1796_v35 = vpack.c.bf16 %v1766_v38, %v1765_v6  ;;  %2514 = vtanh.f32 %v1676_v15  ;;  %v1682_v10 = vmul.f32 0.7978846, %v1618_v19 }
 0x36c   : > { %v1524_v8 = vmul.f32 %v3606_v1, %v3606_v1  ;;  %v1587_v36 = vadd.f32 1.0, %v1555_v14  ;;  %v1558_v46 = vmul.f32 0.044715, %v1526_v42  ;;  %v3616_v26 = vadd.f32 %v2272_v50, %v3522_v37  ;;  %v2507_v6 = vpop.eup %2506 }
 0x36d   : > { %v1460_v60 = vpop.f32.mrf.mxu0  ;;  %2516 = vtanh.f32 %v1681_v53  ;;  %v1763_v9 = vmul.f32 %v1731_v44, %v3540_v17  ;;  %v1764_v24 = vmul.f32 %v1732_v59, %v3547_v49  ;;  %v1680_v23 = vmul.f32 0.7978846, %v1616_v11 }
 0x36e   : > { %v1556_v7 = vmul.f32 0.044715, %v1524_v8  ;;  %2518 = vtanh.f32 %v1679_v31  ;;  %v1621_v3 = vmul.f32 %v1589_v20, %v3586_v12  ;;  %v1529_v62 = vmul.f32 %v3616_v26, %v3616_v26 }
 0x36f   : > { %v2273_v43 = vpop.f32.mrf.mxu0  ;;  %v1619_v0 = vmul.f32 %v1587_v36, %v3589_v25  ;;  %v1590_v16 = vadd.f32 1.0, %v1558_v46  ;;  %v1795_v14 = vpack.c.bf16 %v1764_v24, %v1763_v9  ;;  %v3625_v50 = vadd.f32 %v3522_v37, %v1460_v60 }
 0x370   : > { %v1588_v17 = vadd.f32 1.0, %v1556_v7  ;;  %v1561_v15 = vmul.f32 0.044715, %v1529_v62  ;;  %v3628_v49 = vadd.f32 %v2273_v43, %v3522_v37  ;;  %v3634_v53 = vmul.f32 0.5, %v3565_v28 }
 0x371   : > { %v1463_v33 = vpop.f32.mrf.mxu0  ;;  %v3637_v19 = vmul.f32 0.5, %v3570_v29  ;;  %2520 = vtanh.f32 %v1682_v10  ;;  %2298 = vmatprep.mubr.bf16.mxu0 %v1795_v14  ;;  %v1527_v8 = vmul.f32 %v3625_v50, %v3625_v50  ;;  %v1685_v31 = vmul.f32 0.7978846, %v1621_v3 }
 0x372   : > { %v3631_v42 = vadd.f32 %v3522_v37, %v1463_v33  ;;  %2522 = vtanh.f32 %v1680_v23  ;;  %2299 = vmatmul.mubr.bf16.vlgmr.msra.gmra.mxu0 %v1796_v35  ;;  %v1530_v11 = vmul.f32 %v3628_v49, %v3628_v49  ;;  %v1735_v20 = vadd.f32 1.0, %v2503_v45  ;;  %v2509_v9 = vpop.eup %2508 }
 0x373   : > { %v2276_v38 = vpop.f32.mrf.mxu0  ;;  %v1683_v44 = vmul.f32 0.7978846, %v1619_v0  ;;  %v1622_v28 = vmul.f32 %v1590_v16, %v3603_v61  ;;  %v1559_v36 = vmul.f32 0.044715, %v1527_v8  ;;  %v1620_v59 = vmul.f32 %v1588_v17, %v3606_v1 }
 0x374   : > { %v1528_v29 = vmul.f32 %v3631_v42, %v3631_v42  ;;  %v1593_v43 = vadd.f32 1.0, %v1561_v15  ;;  %v1562_v7 = vmul.f32 0.044715, %v1530_v11  ;;  %v1736_v10 = vadd.f32 1.0, %v2507_v6  ;;  %v2511_v3 = vpop.eup %2510 }
 0x375   : > { %v1476_v60 = vpop.f32.mrf.mxu0  ;;  %v1591_v24 = vadd.f32 1.0, %v1559_v36  ;;  %v3648_v33 = vadd.f32 %v2276_v38, %v3522_v37  ;;  %v1737_v45 = vadd.f32 1.0, %v2501_v58  ;;  %v1767_v0 = vmul.f32 %v1735_v20, %v3555_v40 }
 0x376   : > { %v1560_v35 = vmul.f32 0.044715, %v1528_v29  ;;  %v1594_v62 = vadd.f32 1.0, %v1562_v7  ;;  %v1768_v16 = vmul.f32 %v1736_v10, %v3559_v51  ;;  %v1738_v14 = vadd.f32 1.0, %v2505_v2  ;;  %v2513_v36 = vpop.eup %2512 }
 0x377   : > { %v2277_v46 = vpop.f32.mrf.mxu0  ;;  %v1686_v8 = vmul.f32 0.7978846, %v1622_v28  ;;  %v1623_v17 = vmul.f32 %v1591_v24, %v3625_v50  ;;  %v1533_v6 = vmul.f32 %v3648_v33, %v3648_v33  ;;  %v1684_v38 = vmul.f32 0.7978846, %v1620_v59 }
 0x378   : > { %v1592_v15 = vadd.f32 1.0, %v1560_v35  ;;  %v1625_v58 = vmul.f32 %v1593_v43, %v3616_v26  ;;  %v1626_v29 = vmul.f32 %v1594_v62, %v3628_v49  ;;  %v1797_v7 = vpack.c.bf16 %v1768_v16, %v1767_v0  ;;  %v2515_v55 = vpop.eup %2514 }
 0x379   : > { %v1479_v23 = vpop.f32.mrf.mxu0  ;;  %v1565_v51 = vmul.f32 0.044715, %v1533_v6  ;;  %v1769_v2 = vmul.f32 %v1737_v45, %v3552_v47  ;;  %v1770_v20 = vmul.f32 %v1738_v14, %v3557_v41  ;;  %2524 = vtanh.f32 %v1685_v31 }
 0x37a   : > { %v1624_v40 = vmul.f32 %v1592_v15, %v3631_v42  ;;  %v3660_v28 = vpop.eup %2516  ;;  %2302 = vmatprep.mubr.bf16.mxu1 %v1797_v7  ;;  %v3663_v10 = vadd.f32 %v3522_v37, %v1476_v60  ;;  %v3666_v59 = vadd.f32 %v2277_v46, %v3522_v37  ;;  %v3669_v43 = vadd.f32 %v3522_v37, %v1479_v23 }
 0x37b   : > { %v2280_v11 = vpop.f32.mrf.mxu0  ;;  %v3671_v35 = vpop.eup %2518  ;;  %2526 = vtanh.f32 %v1683_v44  ;;  %v1687_v47 = vmul.f32 0.7978846, %v1623_v17  ;;  %v1597_v45 = vadd.f32 1.0, %v1565_v51  ;;  %v1798_v41 = vpack.c.bf16 %v1770_v20, %v1769_v2 }
 0x37c   : > { %2528 = vtanh.f32 %v1686_v8  ;;  %v1688_v62 = vmul.f32 0.7978846, %v1624_v40  ;;  %v1531_v31 = vmul.f32 %v3663_v10, %v3663_v10  ;;  %v1534_v60 = vmul.f32 %v3666_v59, %v3666_v59 }
 0x37d   : > { %v1492_v24 = vpop.f32.mrf.mxu0  ;;  %2530 = vtanh.f32 %v1684_v38  ;;  %v1689_v46 = vmul.f32 0.7978846, %v1625_v58  ;;  %v1690_v0 = vmul.f32 0.7978846, %v1626_v29  ;;  %2303 = vmatmul.mubr.bf16.vlgmr.msra.gmra.mxu1 %v1798_v41  ;;  %v1532_v23 = vmul.f32 %v3669_v43, %v3669_v43 }
 0x37e   : > { %v2521_v16 = vpop.eup %2520  ;;  %v1629_v44 = vmul.f32 %v1597_v45, %v3648_v33  ;;  %v1563_v14 = vmul.f32 0.044715, %v1531_v31  ;;  %v1566_v17 = vmul.f32 0.044715, %v1534_v60  ;;  %v1739_v8 = vadd.f32 1.0, %v2511_v3 }
 0x37f   : > { %v2281_v15 = vpop.f32.mrf.mxu0  ;;  %v2523_v6 = vpop.eup %2522  ;;  %2532 = vtanh.f32 %v1687_v47  ;;  %v1564_v7 = vmul.f32 0.044715, %v1532_v23  ;;  %v1740_v40 = vadd.f32 1.0, %v2515_v55  ;;  %v3681_v51 = vadd.f32 %v2280_v11, %v3522_v37 }
 0x380   : > { %v1648_v38 = vmul.f32 0.5, %v3583_v32  ;;  %2534 = vtanh.f32 %v1688_v62  ;;  %v1595_v58 = vadd.f32 1.0, %v1563_v14  ;;  %v1741_v29 = vadd.f32 1.0, %v2509_v9 }
 0x381   : > { %v1598_v2 = vadd.f32 1.0, %v1566_v17  ;;  %v1596_v20 = vadd.f32 1.0, %v1564_v7  ;;  %v1771_v45 = vmul.f32 %v1739_v8, %v3567_v30  ;;  %v1772_v41 = vmul.f32 %v1740_v40, %v3580_v22  ;;  %v1495_v55 = vpop.f32.mrf.mxu0 }
 0x382   : > { %2536 = vtanh.f32 %v1689_v46  ;;  %v1693_v3 = vmul.f32 0.7978846, %v1629_v44  ;;  %v1627_v47 = vmul.f32 %v1595_v58, %v3663_v10  ;;  %v1742_v31 = vadd.f32 1.0, %v2513_v36 }
 0x383   : > { %2538 = vtanh.f32 %v1690_v0  ;;  %v1628_v11 = vmul.f32 %v1596_v20, %v3669_v43  ;;  %v1799_v60 = vpack.c.bf16 %v1772_v41, %v1771_v45  ;;  %v1537_v32 = vmul.f32 %v3681_v51, %v3681_v51 }
 0x384   : > { %v1691_v9 = vmul.f32 0.7978846, %v1627_v47  ;;  %v1773_v62 = vmul.f32 %v1741_v29, %v3562_v18  ;;  %v1774_v30 = vmul.f32 %v1742_v31, %v3573_v56  ;;  %v3693_v22 = vadd.f32 %v3522_v37, %v1492_v24 }
 0x385   : > { %v1630_v46 = vmul.f32 %v1598_v2, %v3666_v59  ;;  %v1692_v23 = vmul.f32 0.7978846, %v1628_v11  ;;  %2306 = vmatprep.mubr.bf16.mxu1 %v1799_v60  ;;  %v3697_v36 = vadd.f32 %v2281_v15, %v3522_v37  ;;  %v3700_v0 = vadd.f32 %v3522_v37, %v1495_v55 }
 0x386   : > { %v1651_v44 = vmul.f32 0.5, %v3589_v25  ;;  %2540 = vtanh.f32 %v1693_v3  ;;  %v1800_v14 = vpack.c.bf16 %v1774_v30, %v1773_v62  ;;  %v1535_v18 = vmul.f32 %v3693_v22, %v3693_v22  ;;  %v2525_v56 = vpop.eup %2524 }
 0x387   : > { %v1654_v24 = vmul.f32 0.5, %v3603_v61  ;;  %2542 = vtanh.f32 %v1691_v9  ;;  %v1569_v17 = vmul.f32 0.044715, %v1537_v32  ;;  %v1538_v8 = vmul.f32 %v3697_v36, %v3697_v36 }
 0x388   : > { %v2527_v15 = vpop.eup %2526  ;;  %v1652_v7 = vmul.f32 0.5, %v3606_v1  ;;  %2544 = vtanh.f32 %v1692_v23  ;;  %2307 = vmatmul.mubr.bf16.gmra.mxu1 %v1800_v14  ;;  %v1567_v37 = vmul.f32 0.044715, %v1535_v18  ;;  %v1536_v25 = vmul.f32 %v3700_v0, %v3700_v0 }
 0x389   : > { %v2529_v40 = vpop.eup %2528  ;;  %v1694_v58 = vmul.f32 0.7978846, %v1630_v46  ;;  %v1570_v29 = vmul.f32 0.044715, %v1538_v8  ;;  %v1743_v2 = vadd.f32 1.0, %v3671_v35  ;;  %v1744_v61 = vadd.f32 1.0, %v2523_v6 }
 0x38a   : > { %v2531_v20 = vpop.eup %2530  ;;  %v1599_v45 = vadd.f32 1.0, %v1567_v37  ;;  %v1568_v41 = vmul.f32 0.044715, %v1536_v25  ;;  %v1745_v3 = vadd.f32 1.0, %v3660_v28  ;;  %v1746_v47 = vadd.f32 1.0, %v2521_v16 }
 0x38b   : > { %v1601_v31 = vadd.f32 1.0, %v1569_v17  ;;  %v1602_v1 = vadd.f32 1.0, %v1570_v29  ;;  %v1775_v55 = vmul.f32 %v1743_v2, %v3634_v53  ;;  %v1776_v11 = vmul.f32 %v1744_v61, %v1648_v38 }
 0x38c   : > { %v2533_v60 = vpop.eup %2532  ;;  %v1631_v32 = vmul.f32 %v1599_v45, %v3693_v22  ;;  %v1600_v9 = vadd.f32 1.0, %v1568_v41  ;;  %v1777_v62 = vmul.f32 %v1745_v3, %v3592_v54  ;;  %v1778_v35 = vmul.f32 %v1746_v47, %v3637_v19 }
 0x38d   : > { %v2535_v6 = vpop.eup %2534  ;;  %2546 = vtanh.f32 %v1694_v58  ;;  %v1801_v30 = vpack.c.bf16 %v1776_v11, %v1775_v55  ;;  %v1747_v46 = vadd.f32 1.0, %v2527_v15  ;;  %v1748_v23 = vadd.f32 1.0, %v2531_v20 }
 0x38e   : > { %v1695_v28 = vmul.f32 0.7978846, %v1631_v32  ;;  %v1634_v16 = vmul.f32 %v1602_v1, %v3697_v36  ;;  %v1632_v14 = vmul.f32 %v1600_v9, %v3700_v0  ;;  %v1802_v53 = vpack.c.bf16 %v1778_v35, %v1777_v62 }
 0x38f   : > { %v2537_v38 = vpop.eup %2536  ;;  %v1633_v18 = vmul.f32 %v1601_v31, %v3681_v51  ;;  %2310 = vmatprep.mubr.bf16.mxu1 %v1801_v30  ;;  %v1779_v17 = vmul.f32 %v1747_v46, %v1651_v44  ;;  %v1780_v8 = vmul.f32 %v1748_v23, %v1652_v7  ;;  %v1750_v54 = vadd.f32 1.0, %v2529_v40 }
 0x390   : > { %v2539_v37 = vpop.eup %2538  ;;  %2548 = vtanh.f32 %v1695_v28  ;;  %v1696_v19 = vmul.f32 0.7978846, %v1632_v14  ;;  %2311 = vmatmul.mubr.bf16.gmra.mxu1 %v1802_v53  ;;  %v1749_v25 = vadd.f32 1.0, %v2525_v56  ;;  %v1751_v15 = vadd.f32 1.0, %v2533_v60 }
 0x391   : > { %v1655_v58 = vmul.f32 0.5, %v3625_v50  ;;  %v1656_v29 = vmul.f32 0.5, %v3631_v42  ;;  %v1803_v2 = vpack.c.bf16 %v1780_v8, %v1779_v17  ;;  %v1752_v61 = vadd.f32 1.0, %v2535_v6 }
 0x392   : > { %v1653_v20 = vmul.f32 0.5, %v3586_v12  ;;  %v1698_v45 = vmul.f32 0.7978846, %v1634_v16  ;;  %2550 = vtanh.f32 %v1696_v19  ;;  %v1782_v41 = vmul.f32 %v1750_v54, %v1654_v24 }
 0x393   : > { %v2541_v44 = vpop.eup %2540  ;;  %2314 = vmatprep.mubr.bf16.mxu1 %v1803_v2  ;;  %v1783_v7 = vmul.f32 %v1751_v15, %v1655_v58  ;;  %v1784_v40 = vmul.f32 %v1752_v61, %v1656_v29  ;;  %v1697_v47 = vmul.f32 0.7978846, %v1633_v18  ;;  %v1754_v55 = vadd.f32 1.0, %v2539_v37 }
 0x394   : > { %v2543_v3 = vpop.eup %2542  ;;  %v1781_v31 = vmul.f32 %v1749_v25, %v1653_v20  ;;  %2552 = vtanh.f32 %v1698_v45  ;;  %v1660_v11 = vmul.f32 0.5, %v3669_v43  ;;  %v1658_v12 = vmul.f32 0.5, %v3628_v49  ;;  %v3736_v45 = vld [vmem:[%s3882_s6] ss:$0 sm:$0xff] }
 0x395   : > { %v2545_v56 = vpop.eup %2544  ;;  %v1805_v1 = vpack.c.bf16 %v1784_v40, %v1783_v7  ;;  %v1755_v60 = vadd.f32 1.0, %v2543_v3  ;;  %2554 = vtanh.f32 %v1697_v47  ;;  %v1753_v24 = vadd.f32 1.0, %v2537_v38 }
 0x396   : > { %v1804_v50 = vpack.c.bf16 %v1782_v41, %v1781_v31  ;;  %v1756_v42 = vadd.f32 1.0, %v2545_v56  ;;  %v1659_v32 = vmul.f32 0.5, %v3663_v10  ;;  %v1657_v35 = vmul.f32 0.5, %v3616_v26 }
 0x397   : > { %v1786_v6 = vmul.f32 %v1754_v55, %v1658_v12  ;;  %v1662_v49 = vmul.f32 0.5, %v3666_v59  ;;  %v1664_v38 = vmul.f32 0.5, %v3700_v0  ;;  %v1757_v10 = vadd.f32 1.0, %v2541_v44 }
 0x398   : > { %2315 = vmatmul.mubr.bf16.gmra.mxu1 %v1804_v50  ;;  %v1788_v9 = vmul.f32 %v1756_v42, %v1660_v11  ;;  %v1787_v30 = vmul.f32 %v1755_v60, %v1659_v32  ;;  %v1785_v46 = vmul.f32 %v1753_v24, %v1657_v35  ;;  %v1663_v17 = vmul.f32 0.5, %v3693_v22 }
 0x399   : > { %2318 = vmatprep.mubr.bf16.mxu1 %v1805_v1  ;;  %v1661_v26 = vmul.f32 0.5, %v3648_v33  ;;  %v1666_v0 = vmul.f32 0.5, %v3697_v36  ;;  %v1665_v22 = vmul.f32 0.5, %v3681_v51 }
 0x39a   : > { %v2547_v62 = vpop.eup %2546  ;;  %v1807_v28 = vpack.c.bf16 %v1788_v9, %v1787_v30  ;;  %v1806_v16 = vpack.c.bf16 %v1786_v6, %v1785_v46 }
 0x39b   : > { %v1758_v43 = vadd.f32 1.0, %v2547_v62  ;;  %v1789_v25 = vmul.f32 %v1757_v10, %v1661_v26 }
 0x39d   : > { %v2549_v23 = vpop.eup %2548  ;;  %v1790_v8 = vmul.f32 %v1758_v43, %v1662_v49 }
 0x39e   : > { %v1759_v53 = vadd.f32 1.0, %v2549_v23 }
 0x39f   : > { %v2551_v14 = vpop.eup %2550  ;;  %v1808_v29 = vpack.c.bf16 %v1790_v8, %v1789_v25  ;;  %v3959_v8 = vld [vmem:[#allocation16_spill] sm:$0xff]  ;;  %v3960_v25 = vld [vmem:[#allocation14_spill] sm:$0xff] }
 0x3a0   : > { %2319 = vmatmul.mubr.bf16.gmra.mxu1 %v1806_v16  ;;  %v1760_v18 = vadd.f32 1.0, %v2551_v14  ;;  %v1791_v19 = vmul.f32 %v1759_v53, %v1663_v17 }
 0x3a1   : > { %2322 = vmatprep.mubr.bf16.mxu1 %v1807_v28  ;;  %v2553_v37 = vpop.eup %2552 }
 0x3a2   : > { %v1792_v54 = vmul.f32 %v1760_v18, %v1664_v38  ;;  %v2555_v15 = vpop.eup %2554  ;;  %v1762_v59 = vadd.f32 1.0, %v2553_v37 }
 0x3a3   : > { %v1761_v2 = vadd.f32 1.0, %v2555_v15 }
 0x3a4   : > { %v1809_v58 = vpack.c.bf16 %v1792_v54, %v1791_v19  ;;  %v1794_v61 = vmul.f32 %v1762_v59, %v1666_v0  ;;  %v3961_v59 = vld [vmem:[#allocation18_spill] sm:$0xff] }
 0x3a5   : > { %v1793_v20 = vmul.f32 %v1761_v2, %v1665_v22 }
 0x3a7   : > { %v1810_v33 = vpack.c.bf16 %v1794_v61, %v1793_v20  ;;  %v3962_v61 = vld [vmem:[#allocation17_spill] sm:$0xff] }
 0x3a8   : > { %2323 = vmatmul.mubr.bf16.gmra.mxu1 %v1808_v29 }
 0x3a9   : > { %2326 = vmatprep.mubr.bf16.mxu1 %v1809_v58 }
 0x3b0   : > { %2327 = vmatmul.mubr.bf16.gmra.mxu1 %v1810_v33 }
 0x432   : > { %v2300_v41 = vpop.f32.mrf.mxu0 }
 0x433   : > { %v1925_v44 = vadd.f32 %v2300_v41, %v3736_v45 }
 0x434   : > { %v1916_v51 = vpop.f32.mrf.mxu0 }
 0x435   : > { %v2045_v36 = vadd.f32 %v1925_v44, %v3014_v27  ;;  %v1917_v7 = vadd.f32 %v3736_v45, %v1916_v51  ;;  %v3963_v44 = vld [vmem:[#allocation3_spill] sm:$0xff] }
 0x436   : > { %v2301_v40 = vpop.f32.mrf.mxu0 }
 0x437   : > { %2077 = vst.msk [vmem:[%s3744_s18 + $0x10] sm:$0xff] %vm317_vm0, %v2045_v36  ;;  %v2043_v3 = vadd.f32 %v1917_v7, %v2999_v57  ;;  %v1928_v47 = vadd.f32 %v2301_v40, %v3736_v45  ;;  %v3964_v40 = vld [vmem:[#allocation2_spill] sm:$0xff] }
 0x438   : > { %v1919_v31 = vpop.f32.mrf.mxu0 }
 0x439   : > { %2075 = vst.msk [vmem:[%s3744_s18] sm:$0xff] %vm317_vm0, %v2043_v3  ;;  %v2046_v56 = vadd.f32 %v1928_v47, %v3026_v5  ;;  %v1920_v1 = vadd.f32 %v3736_v45, %v1919_v31 }
 0x43b   : > { %2078 = vst.msk [vmem:[%s3744_s18 + $0x18] sm:$0xff] %vm317_vm0, %v2046_v56  ;;  %v2044_v27 = vadd.f32 %v1920_v1, %v3011_v39  ;;  %v3965_v56 = vld [vmem:[#allocation6_spill] sm:$0xff] }
 0x43d   : > { %2076 = vst.msk [vmem:[%s3744_s18 + $0x8] sm:$0xff] %vm317_vm0, %v2044_v27  ;;  %v2304_v50 = vpop.f32.mrf.mxu1 }
 0x43e   : > { %v1941_v57 = vadd.f32 %v2304_v50, %v3736_v45 }
 0x43f   : > { %v1932_v55 = vpop.f32.mrf.mxu1 }
 0x440   : > { %v2049_v42 = vadd.f32 %v1941_v57, %v3046_v63  ;;  %v1933_v11 = vadd.f32 %v3736_v45, %v1932_v55  ;;  %v3966_v57 = vld [vmem:[#allocation4_spill] sm:$0xff] }
 0x441   : > { %v2305_v60 = vpop.f32.mrf.mxu1 }
 0x442   : > { %2081 = vst.msk [vmem:[%s3744_s18 + $0x30] sm:$0xff] %vm317_vm0, %v2049_v42  ;;  %v2047_v5 = vadd.f32 %v1933_v11, %v3029_v52  ;;  %v1944_v12 = vadd.f32 %v2305_v60, %v3736_v45  ;;  %v3967_v60 = vld [vmem:[#allocation19_spill] sm:$0xff] }
 0x443   : > { %v1935_v39 = vpop.f32.mrf.mxu1 }
 0x444   : > { %2079 = vst.msk [vmem:[%s3744_s18 + $0x20] sm:$0xff] %vm317_vm0, %v2047_v5  ;;  %v2050_v24 = vadd.f32 %v1944_v12, %v3058_v13  ;;  %v1936_v32 = vadd.f32 %v3736_v45, %v1935_v39 }
 0x446   : > { %2082 = vst.msk [vmem:[%s3744_s18 + $0x38] sm:$0xff] %vm317_vm0, %v2050_v24  ;;  %v2048_v63 = vadd.f32 %v1936_v32, %v3043_v4  ;;  %v3968_v24 = vld [vmem:[#allocation5_spill] sm:$0xff] }
 0x448   : > { %2080 = vst.msk [vmem:[%s3744_s18 + $0x28] sm:$0xff] %vm317_vm0, %v2048_v63  ;;  %v2308_v9 = vpop.f32.mrf.mxu1 }
 0x449   : > { %v1957_v52 = vadd.f32 %v2308_v9, %v3736_v45 }
 0x44a   : > { %v1948_v62 = vpop.f32.mrf.mxu1 }
 0x44b   : > { %v2053_v35 = vadd.f32 %v1957_v52, %v3078_v34  ;;  %v1949_v6 = vadd.f32 %v3736_v45, %v1948_v62  ;;  %v3956_v34 = vld [vmem:[#allocation12_spill] sm:$0xff] }
 0x44c   : > { %v2309_v30 = vpop.f32.mrf.mxu1  ;;  %v3969_v52 = vld [vmem:[#allocation8_spill] sm:$0xff] }
 0x44d   : > { %2085 = vst.msk [vmem:[%s3744_s18 + $0x50] sm:$0xff] %vm317_vm0, %v2053_v35  ;;  %v2051_v13 = vadd.f32 %v1949_v6, %v3061_v48  ;;  %v1960_v4 = vadd.f32 %v2309_v30, %v3736_v45  ;;  %v3957_v48 = vld [vmem:[#allocation15_spill] sm:$0xff]  ;;  %v3970_v30 = vld [vmem:[#allocation20_spill] sm:$0xff] }
 0x44e   : > { %v1951_v46 = vpop.f32.mrf.mxu1 }
 0x44f   : > { %2083 = vst.msk [vmem:[%s3744_s18 + $0x40] sm:$0xff] %vm317_vm0, %v2051_v13  ;;  %v2054_v23 = vadd.f32 %v1960_v4, %v3090_v21  ;;  %v1952_v28 = vadd.f32 %v3736_v45, %v1951_v46  ;;  %v3958_v21 = vld [vmem:[#allocation13_spill] sm:$0xff] }
 0x450   : > { %v2312_v16 = vpop.f32.mrf.mxu1 }
 0x451   : > { %2086 = vst.msk [vmem:[%s3744_s18 + $0x58] sm:$0xff] %vm317_vm0, %v2054_v23  ;;  %v2052_v43 = vadd.f32 %v1952_v28, %v3956_v34  ;;  %v1973_v14 = vadd.f32 %v2312_v16, %v3736_v45  ;;  %v3971_v23 = vld [vmem:[#allocation9_spill] sm:$0xff] }
 0x452   : > { %v1964_v53 = vpop.f32.mrf.mxu1 }
 0x453   : > { %2084 = vst.msk [vmem:[%s3744_s18 + $0x48] sm:$0xff] %vm317_vm0, %v2052_v43  ;;  %v2057_v49 = vadd.f32 %v1973_v14, %v3957_v48  ;;  %v1965_v38 = vadd.f32 %v3736_v45, %v1964_v53  ;;  %v3972_v43 = vld [vmem:[#allocation7_spill] sm:$0xff] }
 0x454   : > { %v2313_v10 = vpop.f32.mrf.mxu1 }
 0x455   : > { %2089 = vst.msk [vmem:[%s3744_s18 + $0x70] sm:$0xff] %vm317_vm0, %v2057_v49  ;;  %v2055_v18 = vadd.f32 %v1965_v38, %v3958_v21  ;;  %v1976_v17 = vadd.f32 %v2313_v10, %v3736_v45  ;;  %v3973_v49 = vld [vmem:[#allocation21_spill] sm:$0xff] }
 0x456   : > { %v1967_v26 = vpop.f32.mrf.mxu1 }
 0x457   : > { %2087 = vst.msk [vmem:[%s3744_s18 + $0x60] sm:$0xff] %vm317_vm0, %v2055_v18  ;;  %v2058_v54 = vadd.f32 %v1976_v17, %v3959_v8  ;;  %v1968_v37 = vadd.f32 %v3736_v45, %v1967_v26  ;;  %v3974_v18 = vld [vmem:[#allocation10_spill] sm:$0xff] }
 0x458   : > { %v2316_v19 = vpop.f32.mrf.mxu1 }
 0x459   : > { %2090 = vst.msk [vmem:[%s3744_s18 + $0x78] sm:$0xff] %vm317_vm0, %v2058_v54  ;;  %v2056_v15 = vadd.f32 %v1968_v37, %v3960_v25  ;;  %v1989_v58 = vadd.f32 %v2316_v19, %v3736_v45  ;;  %v3975_v54 = vld [vmem:[#allocation22_spill] sm:$0xff]  ;;  %v3976_v25 = vld [vmem:[#allocation11_spill] sm:$0xff] }
 0x45a   : > { %v1980_v29 = vpop.f32.mrf.mxu1 }
 0x45b   : > { %2088 = vst.msk [vmem:[%s3744_s18 + $0x68] sm:$0xff] %vm317_vm0, %v2056_v15  ;;  %v2061_v0 = vadd.f32 %v1989_v58, %v3961_v59  ;;  %v1981_v2 = vadd.f32 %v3736_v45, %v1980_v29 }
 0x45c   : > { %v2317_v22 = vpop.f32.mrf.mxu1 }
 0x45d   : > { %2093 = vst.msk [vmem:[%s3744_s18 + $0x90] sm:$0xff] %vm317_vm0, %v2061_v0  ;;  %v2059_v20 = vadd.f32 %v1981_v2, %v3962_v61  ;;  %v1992_v33 = vadd.f32 %v2317_v22, %v3736_v45 }
 0x45e   : > { %v1983_v41 = vpop.f32.mrf.mxu1 }
 0x45f   : > { %2091 = vst.msk [vmem:[%s3744_s18 + $0x80] sm:$0xff] %vm317_vm0, %v2059_v20  ;;  %v2062_v51 = vadd.f32 %v1992_v33, %v3963_v44  ;;  %v1984_v36 = vadd.f32 %v3736_v45, %v1983_v41 }
 0x460   : > { %v2320_v7 = vpop.f32.mrf.mxu1 }
 0x461   : > { %2094 = vst.msk [vmem:[%s3744_s18 + $0x98] sm:$0xff] %vm317_vm0, %v2062_v51  ;;  %v2060_v3 = vadd.f32 %v1984_v36, %v3964_v40  ;;  %v2005_v47 = vadd.f32 %v2320_v7, %v3736_v45 }
 0x462   : > { %v1996_v31 = vpop.f32.mrf.mxu1 }
 0x463   : > { %2092 = vst.msk [vmem:[%s3744_s18 + $0x88] sm:$0xff] %vm317_vm0, %v2060_v3  ;;  %v2065_v1 = vadd.f32 %v2005_v47, %v3965_v56  ;;  %v1997_v27 = vadd.f32 %v3736_v45, %v1996_v31 }
 0x464   : > { %v2321_v50 = vpop.f32.mrf.mxu1 }
 0x465   : > { %2097 = vst.msk [vmem:[%s3744_s18 + $0xb0] sm:$0xff] %vm317_vm0, %v2065_v1  ;;  %v2063_v55 = vadd.f32 %v1997_v27, %v3966_v57  ;;  %v2008_v42 = vadd.f32 %v2321_v50, %v3736_v45 }
 0x466   : > { %v1999_v11 = vpop.f32.mrf.mxu1 }
 0x467   : > { %2095 = vst.msk [vmem:[%s3744_s18 + $0xa0] sm:$0xff] %vm317_vm0, %v2063_v55  ;;  %v2066_v5 = vadd.f32 %v2008_v42, %v3967_v60  ;;  %v2000_v12 = vadd.f32 %v3736_v45, %v1999_v11 }
 0x468   : > { %v2324_v39 = vpop.f32.mrf.mxu1 }
 0x469   : > { %2098 = vst.msk [vmem:[%s3744_s18 + $0xb8] sm:$0xff] %vm317_vm0, %v2066_v5  ;;  %v2064_v32 = vadd.f32 %v2000_v12, %v3968_v24  ;;  %v2021_v63 = vadd.f32 %v2324_v39, %v3736_v45 }
 0x46a   : > { %v2012_v9 = vpop.f32.mrf.mxu1 }
 0x46b   : > { %2096 = vst.msk [vmem:[%s3744_s18 + $0xa8] sm:$0xff] %vm317_vm0, %v2064_v32  ;;  %v2069_v62 = vadd.f32 %v2021_v63, %v3969_v52  ;;  %v2013_v35 = vadd.f32 %v3736_v45, %v2012_v9 }
 0x46c   : > { %v2325_v6 = vpop.f32.mrf.mxu1 }
 0x46d   : > { %2101 = vst.msk [vmem:[%s3744_s18 + $0xd0] sm:$0xff] %vm317_vm0, %v2069_v62  ;;  %v2067_v13 = vadd.f32 %v2013_v35, %v3970_v30  ;;  %v2024_v4 = vadd.f32 %v2325_v6, %v3736_v45 }
 0x46e   : > { %v2015_v46 = vpop.f32.mrf.mxu1 }
 0x46f   : > { %2099 = vst.msk [vmem:[%s3744_s18 + $0xc0] sm:$0xff] %vm317_vm0, %v2067_v13  ;;  %v2070_v28 = vadd.f32 %v2024_v4, %v3971_v23  ;;  %v2016_v16 = vadd.f32 %v3736_v45, %v2015_v46 }
 0x470   : > { %v2328_v34 = vpop.f32.mrf.mxu1 }
 0x471   : > { %2102 = vst.msk [vmem:[%s3744_s18 + $0xd8] sm:$0xff] %vm317_vm0, %v2070_v28  ;;  %v2068_v14 = vadd.f32 %v2016_v16, %v3972_v43  ;;  %v2037_v53 = vadd.f32 %v2328_v34, %v3736_v45 }
 0x472   : > { %v2028_v48 = vpop.f32.mrf.mxu1 }
 0x473   : > { %2100 = vst.msk [vmem:[%s3744_s18 + $0xc8] sm:$0xff] %vm317_vm0, %v2068_v14  ;;  %v2073_v38 = vadd.f32 %v2037_v53, %v3973_v49  ;;  %v2029_v10 = vadd.f32 %v3736_v45, %v2028_v48 }
 0x474   : > { %v2329_v21 = vpop.f32.mrf.mxu1 }
 0x475   : > { %2105 = vst.msk [vmem:[%s3744_s18 + $0xf0] sm:$0xff] %vm317_vm0, %v2073_v38  ;;  %v2071_v17 = vadd.f32 %v2029_v10, %v3974_v18  ;;  %v2040_v26 = vadd.f32 %v2329_v21, %v3736_v45 }
 0x476   : > { %v2031_v8 = vpop.f32.mrf.mxu1 }
 0x477   : > { %2103 = vst.msk [vmem:[%s3744_s18 + $0xe0] sm:$0xff] %vm317_vm0, %v2071_v17  ;;  %v2074_v37 = vadd.f32 %v2040_v26, %v3975_v54  ;;  %v2032_v19 = vadd.f32 %v3736_v45, %v2031_v8 }
 0x479   : > { %2106 = vst.msk [vmem:[%s3744_s18 + $0xf8] sm:$0xff] %vm317_vm0, %v2074_v37  ;;  %v2072_v15 = vadd.f32 %v2032_v19, %v3976_v25 }
 0x47b   : > { %2104 = vst.msk [vmem:[%s3744_s18 + $0xe8] sm:$0xff] %vm317_vm0, %v2072_v15 }
 0x47c PF: > { %s17_s24 = sadd.s32 1, %s2571_s24  }
 0x47d   : > { %p14_p4 = scmp.ge.s32.totalorder %s17_s24, 4  }
 0x47f   :  { %16 = sbr.rel (!%p14_p4) target bundleno = 1 (0x1), region = 78 }

</bundles_post_ra>
